<compile_context>
chip_gen: v5e
topology: v5e:2x2
jax: 0.10.0
libtpu: 0.0.40
codegen_flags: <defaults>
</compile_context>

<pallas_src>
import functools

import jax
import jax.numpy as jnp
from jax import lax
from jax.experimental import pallas as pl
from jax.experimental.pallas import tpu as pltpu

IN_DIM = 600
H1, H2, H3, H4 = 300, 100, 100, 100
H1P, HP = 384, 128              # hidden widths padded to multiples of 128 lanes

_TARGET_BLOCK_ROWS = 512        # flattened (candidate) rows per grid step
_MAX_SINGLE_BLOCK_ROWS = 1024   # below this, just use a single block


# ------------------------------- kernel -------------------------------------


def _fused_mlp_log_softmax_kernel(x_ref, w1_ref, b1_ref, w2_ref, b2_ref,
                                  w3_ref, b3_ref, w4_ref, b4_ref,
                                  wp_ref, bp_ref, ssel_ref, gmat_ref,
                                  o_ref, *, valid_rows):
    f32 = jnp.float32
    bf16 = jnp.bfloat16

    # ---- MLP body: 4x (Linear + ReLU).  bf16 MXU matmuls, f32 accumulate. ----
    h = x_ref[...]                                                    # (R, 600) f32
    h = jnp.maximum(jnp.dot(h.astype(bf16), w1_ref[...],
                            preferred_element_type=f32) + b1_ref[...], 0.0)
    h = jnp.maximum(jnp.dot(h.astype(bf16), w2_ref[...],
                            preferred_element_type=f32) + b2_ref[...], 0.0)
    h = jnp.maximum(jnp.dot(h.astype(bf16), w3_ref[...],
                            preferred_element_type=f32) + b3_ref[...], 0.0)
    h = jnp.maximum(jnp.dot(h.astype(bf16), w4_ref[...],
                            preferred_element_type=f32) + b4_ref[...], 0.0)

    # ---- policy head (100 -> 1): VPU multiply + lane reduction instead of a
    #      width-1 MXU matmul / lane-sparse result layout.                  ----
    s = jnp.sum(h * wp_ref[...], axis=-1, keepdims=True) + bp_ref[...]  # (R, 1)

    # ---- mask rows past the real batch (partial boundary grid block) so the
    #      undefined padded input rows cannot contaminate the scatter below. ----
    rows = x_ref.shape[0]
    row_id = (lax.broadcasted_iota(jnp.int32, (rows, 1), 0)
              + pl.program_id(0) * rows)
    s = jnp.where(row_id < valid_rows, s, 0.0)

    # ---- scatter the (R,1) score column into a (TB, N) lane-dense block:
    #      scores[b, n] = s[b*N + n].  ssel[r, n] = (r % N == n) and
    #      gmat[b, r] = (r // N == b) are precomputed 0/1 constants.         ----
    p = s * ssel_ref[...]                                             # (R, N)
    scores = jnp.dot(gmat_ref[...], p, preferred_element_type=f32)    # (TB, N)

    # ---- fused, numerically stable log_softmax over the N candidates.     ----
    m = jnp.max(scores, axis=-1, keepdims=True)
    z = scores - m
    o_ref[...] = z - jnp.log(jnp.sum(jnp.exp(z), axis=-1, keepdims=True))


# ------------------------------- wrapper ------------------------------------


def _choose_block_batch(batch, n_cand):
    """Batch rows per grid step (TB); TB*N flattened rows land in one block."""
    if batch * n_cand <= _MAX_SINGLE_BLOCK_ROWS:
        return batch
    tb = max(1, _TARGET_BLOCK_ROWS // n_cand)
    tb = max(8, (tb // 8) * 8)        # keep the (8,128) block-shape constraint
    return min(tb, batch)
    # TODO(synk): very large N (>~800 candidates) would additionally need
    # feature-dim tiling to keep a single block under the VMEM budget.


def _pad2(a, rows, cols):
    return jnp.pad(a, ((0, rows - a.shape[0]), (0, cols - a.shape[1])))


def _prepare_params(params):
    """Zero-pad hidden dims to lane multiples; cast matmul weights to bf16."""
    bf16 = jnp.bfloat16
    return {
        "w1": _pad2(params["w1"], IN_DIM, H1P).astype(bf16),
        "b1": _pad2(params["b1"], 1, H1P),
        "w2": _pad2(params["w2"], H1P, HP).astype(bf16),
        "b2": _pad2(params["b2"], 1, HP),
        "w3": _pad2(params["w3"], HP, HP).astype(bf16),
        "b3": _pad2(params["b3"], 1, HP),
        "w4": _pad2(params["w4"], HP, HP).astype(bf16),
        "b4": _pad2(params["b4"], 1, HP),
        "wp": _pad2(params["wp"].reshape(1, -1), 1, HP),   # head stays f32
        "bp": params["bp"].reshape(1, 1),
    }


def model_forward(x, params):
    """x: (B, N, 600) float32 -> (B, N) float32 log-probabilities."""
    batch, n_cand, feat = x.shape
    assert feat == IN_DIM
    x2 = x.reshape(batch * n_cand, feat)          # free row-major collapse

    pp = _prepare_params(params)

    tb = _choose_block_batch(batch, n_cand)
    rows = tb * n_cand                            # flattened rows per block
    grid = (pl.cdiv(batch, tb),)

    # 0/1 scatter/gather constants used to regroup the per-candidate score
    # column into a (tb, n_cand) lane-dense block inside the kernel.
    r_idx = jnp.arange(rows, dtype=jnp.int32)
    ssel = (r_idx[:, None] % n_cand
            == jnp.arange(n_cand, dtype=jnp.int32)[None, :]).astype(jnp.float32)
    gmat = (r_idx[None, :] // n_cand
            == jnp.arange(tb, dtype=jnp.int32)[:, None]).astype(jnp.float32)

    def resident(arr):                            # whole array, VMEM-resident
        return pl.BlockSpec(arr.shape, lambda i: (0, 0))

    in_specs = [pl.BlockSpec((rows, feat), lambda i: (i, 0)),
                resident(pp["w1"]), resident(pp["b1"]),
                resident(pp["w2"]), resident(pp["b2"]),
                resident(pp["w3"]), resident(pp["b3"]),
                resident(pp["w4"]), resident(pp["b4"]),
                resident(pp["wp"]), resident(pp["bp"]),
                resident(ssel), resident(gmat)]

    kernel = functools.partial(_fused_mlp_log_softmax_kernel,
                               valid_rows=batch * n_cand)

    return pl.pallas_call(
        kernel,
        out_shape=jax.ShapeDtypeStruct((batch, n_cand), jnp.float32),
        grid=grid,
        in_specs=in_specs,
        out_specs=pl.BlockSpec((tb, n_cand), lambda i: (i, 0)),
        compiler_params=pltpu.CompilerParams(
            dimension_semantics=("parallel",),        # megacore on v7x
            vmem_limit_bytes=32 * 1024 * 1024),
    )(x2, pp["w1"], pp["b1"], pp["w2"], pp["b2"], pp["w3"], pp["b3"],
      pp["w4"], pp["b4"], pp["wp"], pp["bp"], ssel, gmat)


# --------------------------- parameter init ----------------------------------


def init_params(key):
    """Init mirroring nn.Linear's default U(-1/sqrt(fan_in), +1/sqrt(fan_in))."""
    dims = [(IN_DIM, H1), (H1, H2), (H2, H3), (H3, H4), (H4, 1)]
    names = ["1", "2", "3", "4", "p"]
    params = {}
    for (fan_in, fan_out), n in zip(dims, names):
        key, kw, kb = jax.random.split(key, 3)
        bound = 1.0 / jnp.sqrt(fan_in)
        params[f"w{n}"] = jax.random.uniform(
            kw, (fan_in, fan_out), jnp.float32, -bound, bound)
        params[f"b{n}"] = jax.random.uniform(
            kb, (1, fan_out), jnp.float32, -bound, bound)
    return params


# ------------------------------ references -----------------------------------


def _reference_forward_f32(x, params):
    """Pure-JAX f32 reference (semantics of the PyTorch module)."""
    batch, n_cand, feat = x.shape
    hp = lax.Precision.HIGHEST
    h = x.reshape(batch * n_cand, feat)
    for n in ("1", "2", "3", "4"):
        h = jnp.maximum(
            jnp.dot(h, params[f"w{n}"], precision=hp) + params[f"b{n}"], 0.0)
    s = (jnp.dot(h, params["wp"], precision=hp)
         + params["bp"]).reshape(batch, n_cand)
    return jax.nn.log_softmax(s, axis=-1)


def _reference_forward_bf16(x, params):
    """Reference mirroring the kernel numerics: bf16 matmul inputs, f32 accumulate."""
    batch, n_cand, feat = x.shape
    f32, bf16 = jnp.float32, jnp.bfloat16
    hp = lax.Precision.HIGHEST
    h = x.reshape(batch * n_cand, feat)
    for n in ("1", "2", "3", "4"):
        w = params[f"w{n}"].astype(bf16).astype(f32)
        h = jnp.maximum(
            jnp.dot(h.astype(bf16).astype(f32), w, precision=hp)
            + params[f"b{n}"], 0.0)
    s = (jnp.sum(h * params["wp"].reshape(1, -1), axis=-1, keepdims=True)
         + params["bp"]).reshape(batch, n_cand)
    return jax.nn.log_softmax(s, axis=-1)


# --------------------------------- main ---------------------------------------


if __name__ == "__main__":
    key = jax.random.PRNGKey(0)
    key, kx = jax.random.split(key)
    params = init_params(key)

    # Small case (2 batches of 8 candidate utterances): single block, grid=(1,).
    B, N = 2, 8
    x = jax.random.normal(kx, (B, N, IN_DIM), jnp.float32)
    out = jax.block_until_ready(model_forward(x, params))
    assert out.shape == (B, N)
    assert bool(jnp.all(jnp.isfinite(out)))
    assert jnp.allclose(out, _reference_forward_bf16(x, params),
                        atol=1e-2, rtol=1e-2), "mismatch vs bf16-matmul reference"
    assert jnp.allclose(out, _reference_forward_f32(x, params),
                        atol=1e-1, rtol=1e-1), "mismatch vs f32 reference"
    assert jnp.allclose(jnp.sum(jnp.exp(out), axis=-1), 1.0, atol=1e-3)

    # Larger case exercising the row grid, VMEM-resident weights and the masked
    # partial boundary block (250 batch rows, 64 per grid step -> grid=(4,)).
    key, kx2 = jax.random.split(key)
    B2, N2 = 250, 8
    x_big = jax.random.normal(kx2, (B2, N2, IN_DIM), jnp.float32)
    out_big = jax.block_until_ready(model_forward(x_big, params))
    assert out_big.shape == (B2, N2)
    assert bool(jnp.all(jnp.isfinite(out_big)))
    assert jnp.allclose(out_big, _reference_forward_bf16(x_big, params),
                        atol=1e-2, rtol=1e-2), "mismatch vs bf16-matmul reference (tiled)"

    print("KERNEL_OK")
</pallas_src>

<mosaic_0001>
module attributes {stable_mosaic.version = 11 : i64} {
  func.func @_fused_mlp_log_softmax_kernel(%arg0: i32, %arg1: memref<16x600xf32, #tpu.memory_space<vmem>>, %arg2: memref<600x384xbf16, #tpu.memory_space<vmem>>, %arg3: memref<1x384xf32, #tpu.memory_space<vmem>>, %arg4: memref<384x128xbf16, #tpu.memory_space<vmem>>, %arg5: memref<1x128xf32, #tpu.memory_space<vmem>>, %arg6: memref<128x128xbf16, #tpu.memory_space<vmem>>, %arg7: memref<1x128xf32, #tpu.memory_space<vmem>>, %arg8: memref<128x128xbf16, #tpu.memory_space<vmem>>, %arg9: memref<1x128xf32, #tpu.memory_space<vmem>>, %arg10: memref<1x128xf32, #tpu.memory_space<vmem>>, %arg11: memref<1x1xf32, #tpu.memory_space<vmem>>, %arg12: memref<16x8xf32, #tpu.memory_space<vmem>>, %arg13: memref<2x16xf32, #tpu.memory_space<vmem>>, %arg14: memref<2x8xf32, #tpu.memory_space<vmem>>) attributes {dimension_semantics = [#tpu.dimension_semantics<parallel>], iteration_bounds = array<i64: 1>, scalar_prefetch = 0 : i64, scratch_operands = 0 : i64, tpu.core_type = #tpu.core_type<tc>, window_params = [{transform_indices = @transform_0, window_bounds = array<i64: 16, 600>}, {pipeline_mode = #tpu.pipeline_mode<synchronous>, transform_indices = @transform_1, window_bounds = array<i64: 600, 384>}, {pipeline_mode = #tpu.pipeline_mode<synchronous>, transform_indices = @transform_2, window_bounds = array<i64: 1, 384>}, {pipeline_mode = #tpu.pipeline_mode<synchronous>, transform_indices = @transform_3, window_bounds = array<i64: 384, 128>}, {pipeline_mode = #tpu.pipeline_mode<synchronous>, transform_indices = @transform_4, window_bounds = array<i64: 1, 128>}, {pipeline_mode = #tpu.pipeline_mode<synchronous>, transform_indices = @transform_5, window_bounds = array<i64: 128, 128>}, {pipeline_mode = #tpu.pipeline_mode<synchronous>, transform_indices = @transform_6, window_bounds = array<i64: 1, 128>}, {pipeline_mode = #tpu.pipeline_mode<synchronous>, transform_indices = @transform_7, window_bounds = array<i64: 128, 128>}, {pipeline_mode = #tpu.pipeline_mode<synchronous>, transform_indices = @transform_8, window_bounds = array<i64: 1, 128>}, {pipeline_mode = #tpu.pipeline_mode<synchronous>, transform_indices = @transform_9, window_bounds = array<i64: 1, 128>}, {pipeline_mode = #tpu.pipeline_mode<synchronous>, transform_indices = @transform_10, window_bounds = array<i64: 1, 1>}, {pipeline_mode = #tpu.pipeline_mode<synchronous>, transform_indices = @transform_11, window_bounds = array<i64: 16, 8>}, {pipeline_mode = #tpu.pipeline_mode<synchronous>, transform_indices = @transform_12, window_bounds = array<i64: 2, 16>}, {transform_indices = @transform_13, window_bounds = array<i64: 2, 8>}]} {
    %c0 = arith.constant 0 : index
    %c0_0 = arith.constant 0 : index
    %0 = vector.load %arg1[%c0, %c0_0] : memref<16x600xf32, #tpu.memory_space<vmem>>, vector<16x600xf32>
    %1 = arith.truncf %0 : vector<16x600xf32> to vector<16x600xbf16>
    %c0_1 = arith.constant 0 : index
    %c0_2 = arith.constant 0 : index
    %2 = vector.load %arg2[%c0_1, %c0_2] : memref<600x384xbf16, #tpu.memory_space<vmem>>, vector<600x384xbf16>
    %cst = arith.constant dense<0.000000e+00> : vector<16x384xf32>
    %3 = tpu.matmul %1, %2, %cst {dimension_numbers = #tpu.dot_dimension_numbers<[1], [0], [0], [1], [0, 0, 1, 1], [], []>} : vector<16x600xbf16>, vector<600x384xbf16>, vector<16x384xf32> -> vector<16x384xf32>
    %c0_3 = arith.constant 0 : index
    %c0_4 = arith.constant 0 : index
    %4 = vector.load %arg3[%c0_3, %c0_4] : memref<1x384xf32, #tpu.memory_space<vmem>>, vector<1x384xf32>
    %5 = vector.broadcast %4 : vector<1x384xf32> to vector<16x384xf32>
    %6 = arith.addf %3, %5 : vector<16x384xf32>
    %cst_5 = arith.constant 0.000000e+00 : f32
    %7 = vector.broadcast %cst_5 : f32 to vector<16x384xf32>
    %8 = arith.maximumf %6, %7 : vector<16x384xf32>
    %9 = arith.truncf %8 : vector<16x384xf32> to vector<16x384xbf16>
    %c0_6 = arith.constant 0 : index
    %c0_7 = arith.constant 0 : index
    %10 = vector.load %arg4[%c0_6, %c0_7] : memref<384x128xbf16, #tpu.memory_space<vmem>>, vector<384x128xbf16>
    %cst_8 = arith.constant dense<0.000000e+00> : vector<16x128xf32>
    %11 = tpu.matmul %9, %10, %cst_8 {dimension_numbers = #tpu.dot_dimension_numbers<[1], [0], [0], [1], [0, 0, 1, 1], [], []>} : vector<16x384xbf16>, vector<384x128xbf16>, vector<16x128xf32> -> vector<16x128xf32>
    %c0_9 = arith.constant 0 : index
    %c0_10 = arith.constant 0 : index
    %12 = vector.load %arg5[%c0_9, %c0_10] : memref<1x128xf32, #tpu.memory_space<vmem>>, vector<1x128xf32>
    %13 = vector.broadcast %12 : vector<1x128xf32> to vector<16x128xf32>
    %14 = arith.addf %11, %13 : vector<16x128xf32>
    %cst_11 = arith.constant 0.000000e+00 : f32
    %15 = vector.broadcast %cst_11 : f32 to vector<16x128xf32>
    %16 = arith.maximumf %14, %15 : vector<16x128xf32>
    %17 = arith.truncf %16 : vector<16x128xf32> to vector<16x128xbf16>
    %c0_12 = arith.constant 0 : index
    %c0_13 = arith.constant 0 : index
    %18 = vector.load %arg6[%c0_12, %c0_13] : memref<128x128xbf16, #tpu.memory_space<vmem>>, vector<128x128xbf16>
    %cst_14 = arith.constant dense<0.000000e+00> : vector<16x128xf32>
    %19 = tpu.matmul %17, %18, %cst_14 {dimension_numbers = #tpu.dot_dimension_numbers<[1], [0], [0], [1], [0, 0, 1, 1], [], []>} : vector<16x128xbf16>, vector<128x128xbf16>, vector<16x128xf32> -> vector<16x128xf32>
    %c0_15 = arith.constant 0 : index
    %c0_16 = arith.constant 0 : index
    %20 = vector.load %arg7[%c0_15, %c0_16] : memref<1x128xf32, #tpu.memory_space<vmem>>, vector<1x128xf32>
    %21 = vector.broadcast %20 : vector<1x128xf32> to vector<16x128xf32>
    %22 = arith.addf %19, %21 : vector<16x128xf32>
    %cst_17 = arith.constant 0.000000e+00 : f32
    %23 = vector.broadcast %cst_17 : f32 to vector<16x128xf32>
    %24 = arith.maximumf %22, %23 : vector<16x128xf32>
    %25 = arith.truncf %24 : vector<16x128xf32> to vector<16x128xbf16>
    %c0_18 = arith.constant 0 : index
    %c0_19 = arith.constant 0 : index
    %26 = vector.load %arg8[%c0_18, %c0_19] : memref<128x128xbf16, #tpu.memory_space<vmem>>, vector<128x128xbf16>
    %cst_20 = arith.constant dense<0.000000e+00> : vector<16x128xf32>
    %27 = tpu.matmul %25, %26, %cst_20 {dimension_numbers = #tpu.dot_dimension_numbers<[1], [0], [0], [1], [0, 0, 1, 1], [], []>} : vector<16x128xbf16>, vector<128x128xbf16>, vector<16x128xf32> -> vector<16x128xf32>
    %c0_21 = arith.constant 0 : index
    %c0_22 = arith.constant 0 : index
    %28 = vector.load %arg9[%c0_21, %c0_22] : memref<1x128xf32, #tpu.memory_space<vmem>>, vector<1x128xf32>
    %29 = vector.broadcast %28 : vector<1x128xf32> to vector<16x128xf32>
    %30 = arith.addf %27, %29 : vector<16x128xf32>
    %cst_23 = arith.constant 0.000000e+00 : f32
    %31 = vector.broadcast %cst_23 : f32 to vector<16x128xf32>
    %32 = arith.maximumf %30, %31 : vector<16x128xf32>
    %c0_24 = arith.constant 0 : index
    %c0_25 = arith.constant 0 : index
    %33 = vector.load %arg10[%c0_24, %c0_25] : memref<1x128xf32, #tpu.memory_space<vmem>>, vector<1x128xf32>
    %34 = vector.broadcast %33 : vector<1x128xf32> to vector<16x128xf32>
    %35 = arith.mulf %32, %34 : vector<16x128xf32>
    %cst_26 = arith.constant dense<0.000000e+00> : vector<16xf32>
    %36 = vector.multi_reduction <add>, %35, %cst_26 [1] : vector<16x128xf32> to vector<16xf32>
    %37 = vector.shape_cast %36 : vector<16xf32> to vector<16x1xf32>
    %c0_27 = arith.constant 0 : index
    %c0_28 = arith.constant 0 : index
    %38 = vector.load %arg11[%c0_27, %c0_28] : memref<1x1xf32, #tpu.memory_space<vmem>>, vector<1x1xf32>
    %39 = vector.broadcast %38 : vector<1x1xf32> to vector<16x1xf32>
    %40 = arith.addf %37, %39 : vector<16x1xf32>
    %41 = tpu.iota {dimensions = array<i32: 0>} : vector<16x1xi32>
    %c16_i32 = arith.constant 16 : i32
    %42 = arith.muli %arg0, %c16_i32 : i32
    %43 = vector.broadcast %42 : i32 to vector<16x1xi32>
    %44 = arith.addi %41, %43 : vector<16x1xi32>
    %c16_i32_29 = arith.constant 16 : i32
    %45 = vector.broadcast %c16_i32_29 : i32 to vector<16x1xi32>
    %46 = arith.cmpi slt, %44, %45 : vector<16x1xi32>
    %cst_30 = arith.constant 0.000000e+00 : f32
    %47 = vector.broadcast %cst_30 : f32 to vector<16x1xf32>
    %48 = arith.select %46, %40, %47 : vector<16x1xi1>, vector<16x1xf32>
    %c0_31 = arith.constant 0 : index
    %c0_32 = arith.constant 0 : index
    %49 = vector.load %arg12[%c0_31, %c0_32] : memref<16x8xf32, #tpu.memory_space<vmem>>, vector<16x8xf32>
    %50 = vector.broadcast %48 : vector<16x1xf32> to vector<16x8xf32>
    %51 = arith.mulf %50, %49 : vector<16x8xf32>
    %c0_33 = arith.constant 0 : index
    %c0_34 = arith.constant 0 : index
    %52 = vector.load %arg13[%c0_33, %c0_34] : memref<2x16xf32, #tpu.memory_space<vmem>>, vector<2x16xf32>
    %cst_35 = arith.constant dense<0.000000e+00> : vector<2x8xf32>
    %53 = tpu.matmul %52, %51, %cst_35 {dimension_numbers = #tpu.dot_dimension_numbers<[1], [0], [0], [1], [0, 0, 1, 1], [], []>} : vector<2x16xf32>, vector<16x8xf32>, vector<2x8xf32> -> vector<2x8xf32>
    %cst_36 = arith.constant dense<0xFF800000> : vector<2xf32>
    %54 = vector.multi_reduction <maximumf>, %53, %cst_36 [1] : vector<2x8xf32> to vector<2xf32>
    %55 = vector.shape_cast %54 : vector<2xf32> to vector<2x1xf32>
    %56 = vector.broadcast %55 : vector<2x1xf32> to vector<2x8xf32>
    %57 = arith.subf %53, %56 : vector<2x8xf32>
    %58 = math.exp %57 : vector<2x8xf32>
    %cst_37 = arith.constant dense<0.000000e+00> : vector<2xf32>
    %59 = vector.multi_reduction <add>, %58, %cst_37 [1] : vector<2x8xf32> to vector<2xf32>
    %60 = vector.shape_cast %59 : vector<2xf32> to vector<2x1xf32>
    %61 = math.log %60 : vector<2x1xf32>
    %62 = vector.broadcast %61 : vector<2x1xf32> to vector<2x8xf32>
    %63 = arith.subf %57, %62 : vector<2x8xf32>
    %c0_38 = arith.constant 0 : index
    %c0_39 = arith.constant 0 : index
    %64 = vector.load %arg14[%c0_38, %c0_39] : memref<2x8xf32, #tpu.memory_space<vmem>>, vector<2x8xf32>
    tpu.vector_store %arg14[%c0_38, %c0_39], %63 {strides = array<i32>} : memref<2x8xf32, #tpu.memory_space<vmem>>, vector<2x8xf32>,
    return
  }
  func.func @transform_0(%arg0: i32) -> (i32, i32) {
    %c0_i32 = arith.constant 0 : i32
    %c0_i32_0 = arith.constant 0 : i32
    return %arg0, %c0_i32 : i32, i32
  }
  func.func @transform_1(%arg0: i32) -> (i32, i32) {
    %c0_i32 = arith.constant 0 : i32
    %c0_i32_0 = arith.constant 0 : i32
    %c0_i32_1 = arith.constant 0 : i32
    return %c0_i32, %c0_i32_0 : i32, i32
  }
  func.func @transform_2(%arg0: i32) -> (i32, i32) {
    %c0_i32 = arith.constant 0 : i32
    %c0_i32_0 = arith.constant 0 : i32
    %c0_i32_1 = arith.constant 0 : i32
    return %c0_i32, %c0_i32_0 : i32, i32
  }
  func.func @transform_3(%arg0: i32) -> (i32, i32) {
    %c0_i32 = arith.constant 0 : i32
    %c0_i32_0 = arith.constant 0 : i32
    %c0_i32_1 = arith.constant 0 : i32
    return %c0_i32, %c0_i32_0 : i32, i32
  }
  func.func @transform_4(%arg0: i32) -> (i32, i32) {
    %c0_i32 = arith.constant 0 : i32
    %c0_i32_0 = arith.constant 0 : i32
    %c0_i32_1 = arith.constant 0 : i32
    return %c0_i32, %c0_i32_0 : i32, i32
  }
  func.func @transform_5(%arg0: i32) -> (i32, i32) {
    %c0_i32 = arith.constant 0 : i32
    %c0_i32_0 = arith.constant 0 : i32
    %c0_i32_1 = arith.constant 0 : i32
    return %c0_i32, %c0_i32_0 : i32, i32
  }
  func.func @transform_6(%arg0: i32) -> (i32, i32) {
    %c0_i32 = arith.constant 0 : i32
    %c0_i32_0 = arith.constant 0 : i32
    %c0_i32_1 = arith.constant 0 : i32
    return %c0_i32, %c0_i32_0 : i32, i32
  }
  func.func @transform_7(%arg0: i32) -> (i32, i32) {
    %c0_i32 = arith.constant 0 : i32
    %c0_i32_0 = arith.constant 0 : i32
    %c0_i32_1 = arith.constant 0 : i32
    return %c0_i32, %c0_i32_0 : i32, i32
  }
  func.func @transform_8(%arg0: i32) -> (i32, i32) {
    %c0_i32 = arith.constant 0 : i32
    %c0_i32_0 = arith.constant 0 : i32
    %c0_i32_1 = arith.constant 0 : i32
    return %c0_i32, %c0_i32_0 : i32, i32
  }
  func.func @transform_9(%arg0: i32) -> (i32, i32) {
    %c0_i32 = arith.constant 0 : i32
    %c0_i32_0 = arith.constant 0 : i32
    %c0_i32_1 = arith.constant 0 : i32
    return %c0_i32, %c0_i32_0 : i32, i32
  }
  func.func @transform_10(%arg0: i32) -> (i32, i32) {
    %c0_i32 = arith.constant 0 : i32
    %c0_i32_0 = arith.constant 0 : i32
    %c0_i32_1 = arith.constant 0 : i32
    return %c0_i32, %c0_i32_0 : i32, i32
  }
  func.func @transform_11(%arg0: i32) -> (i32, i32) {
    %c0_i32 = arith.constant 0 : i32
    %c0_i32_0 = arith.constant 0 : i32
    %c0_i32_1 = arith.constant 0 : i32
    return %c0_i32, %c0_i32_0 : i32, i32
  }
  func.func @transform_12(%arg0: i32) -> (i32, i32) {
    %c0_i32 = arith.constant 0 : i32
    %c0_i32_0 = arith.constant 0 : i32
    %c0_i32_1 = arith.constant 0 : i32
    return %c0_i32, %c0_i32_0 : i32, i32
  }
  func.func @transform_13(%arg0: i32) -> (i32, i32) {
    %c0_i32 = arith.constant 0 : i32
    %c0_i32_0 = arith.constant 0 : i32
    return %arg0, %c0_i32 : i32, i32
  }
}

</mosaic_0001>

<bundles_post_ra>
// kernel: tpu_custom_call.1
= control target key start
LH: loop header
LB: loop body
LE: loop exit
PB: predicated region body
PF: predicated region fallthrough
CT: control target
= control target key end

     0   :  { %s2747_s0 = inlined_call_operand.hbm [shape: f32[16,600], index: 0, kind: input, shape index: {}]   ;;  %s2748_s1 = inlined_call_operand.hbm [shape: bf16[600,384], index: 1, kind: input, shape index: {}]   ;;  %s2749_s2 = inlined_call_operand.vmem [shape: f32[1,384], index: 2, kind: input, shape index: {}]   ;;  %s2750_s3 = inlined_call_operand.hbm [shape: bf16[384,128], index: 3, kind: input, shape index: {}]   ;;  %s2751_s4 = inlined_call_operand.vmem [shape: f32[1,128], index: 4, kind: input, shape index: {}]   ;;  %s2752_s5 = inlined_call_operand.hbm [shape: bf16[128,128], index: 5, kind: input, shape index: {}]   ;;  %s2753_s6 = inlined_call_operand.vmem [shape: f32[1,128], index: 6, kind: input, shape index: {}]   ;;  %s2754_s7 = inlined_call_operand.hbm [shape: bf16[128,128], index: 7, kind: input, shape index: {}]   ;;  %s2755_s8 = inlined_call_operand.vmem [shape: f32[1,128], index: 8, kind: input, shape index: {}]   ;;  %s2756_s9 = inlined_call_operand.vmem [shape: f32[1,128], index: 9, kind: input, shape index: {}]   ;;  %s2757_s10 = inlined_call_operand.<no memory space> [shape: f32[1,1], index: 10, kind: input, shape index: {}]   ;;  %s2758_s11 = inlined_call_operand.vmem [shape: f32[16,8], index: 11, kind: input, shape index: {}]   ;;  %s2759_s12 = inlined_call_operand.vmem [shape: f32[2,16], index: 12, kind: input, shape index: {}]   ;;  %s2760_s13 = inlined_call_operand.hbm [shape: f32[2,8], index: 13, kind: output, shape index: {}]  }
   0x1   :  { %v18_v0 = vstv %s2757_s10 }
   0x2   :  { %19 = vst [vmem:[#allocation2] sm:$0x1] %v18_v0 }
   0x3   :  { %20 = vsyncpa [#allocation4], 0 }
   0x4   :  { %21 = vsyncpa [#allocation7], 0 }
   0x5   :  { %22 = vsyncpa [#allocation10], 0  ;;  %s41_s29 = sshll.u32 %s2748_s1, 4  ;;  %s42_s29 = int_to_ptr.hbm [resolvable:$true] %s41_s29 }
   0x6   :  { %23 = vsyncpa [#allocation5], 0  ;;  %s2576_s30 = smov [#allocation6]   ;;  %s2577_s15 = smov 192  }
   0x7   :  { %s43_s14 = sshll.u32 %s2576_s30, 4  ;;  %s2578_s16 = smov 12   ;;  %s44_s14 = int_to_ptr.vmem [resolvable:$true] %s43_s14 }
   0x8   :  { %49 = dma.hbm_to_vmem [thread:$0]  %s42_s29, 14400, %s44_s14, [#allocation7], %s2577_s15, %s2577_s15, %s2578_s16  }
   0x9   :  { %s71_s10 = sshll.u32 %s2752_s5, 4  ;;  %s2579_s19 = smov [#allocation9]   ;;  %s72_s10 = int_to_ptr.hbm [resolvable:$true] %s71_s10 }
   0xa   :  { %s73_s20 = sshll.u32 %s2579_s19, 4  ;;  %s28_s23 = sshll.u32 %s2747_s0, 4  ;;  %s74_s20 = int_to_ptr.vmem [resolvable:$true] %s73_s20  ;;  %s29_s23 = int_to_ptr.hbm [resolvable:$true] %s28_s23 }
   0xb   :  { %s2580_s1 = smov 64   ;;  %s2581_s24 = smov 4  }
   0xc   :  { %79 = dma.hbm_to_vmem [thread:$0]  %s72_s10, 1024, %s74_s20, [#allocation10], %s2580_s1, %s2580_s1, %s2581_s24  }
   0xd   :  { %s2582_s25 = smov [#allocation3]   ;;  %s56_s29 = sshll.u32 %s2750_s3, 4  ;;  %s57_s29 = int_to_ptr.hbm [resolvable:$true] %s56_s29 }
   0xe   :  { %s30_s26 = sshll.u32 %s2582_s25, 4  ;;  %s2583_s5 = smov 640   ;;  %s31_s26 = int_to_ptr.vmem [resolvable:$true] %s30_s26 }
   0xf   :  { %s2584_s30 = smov 40   ;;  %s2585_s14 = smov [#allocation8]  }
  0x10   :  { %36 = dma.hbm_to_vmem [thread:$0]  %s29_s23, 1280, %s31_s26, [#allocation4], %s2583_s5, %s2583_s5, %s2584_s30  }
  0x11   :  { %s58_s15 = sshll.u32 %s2585_s14, 4  ;;  %s86_s17 = sshll.u32 %s2754_s7, 4  ;;  %s59_s15 = int_to_ptr.vmem [resolvable:$true] %s58_s15  ;;  %s87_s17 = int_to_ptr.hbm [resolvable:$true] %s86_s17 }
  0x12   :  { %64 = dma.hbm_to_vmem [thread:$0]  %s57_s29, 3072, %s59_s15, [#allocation7], %s2580_s1, %s2580_s1, %s2581_s24  }
  0x13   :  { %s2586_s18 = smov [#allocation11]  }
  0x14   :  { %s88_s10 = sshll.u32 %s2586_s18, 4  ;;  %s89_s10 = int_to_ptr.vmem [resolvable:$true] %s88_s10 }
  0x15   :  { %94 = dma.hbm_to_vmem [thread:$0]  %s87_s17, 1024, %s89_s10, [#allocation10], %s2580_s1, %s2580_s1, %s2581_s24  }
  0x16   :  { %2568 = dma.done.wait [#allocation4], 1280  }
  0x17   :  { %2569 = vsyncadd [#allocation4], 4294966016 }
  0x18   :  { %2570 = dma.done.wait [#allocation7], 17472  }
  0x19   :  { %2571 = vsyncadd [#allocation7], 4294949824 }
  0x1a   :  { %2572 = dma.done.wait [#allocation10], 2048  }
  0x1b   :  { %2573 = vsyncadd [#allocation10], 4294965248  ;;  %v1727_v1 = vld [vmem:[#allocation6 + $0xa8] sm:$0xf]  ;;  %v2271_v2 = vld [vmem:[#allocation6 + $0xb0] sm:$0xf0] }
  0x1c   :  { %v1823_v3 = vld [vmem:[#allocation6 + $0x168] sm:$0xf]  ;;  %v1728_v4 = vor.u32 %v2271_v2, %v1727_v1  ;;  %v2295_v5 = vld [vmem:[#allocation6 + $0x170] sm:$0xf0]  ;;  %v1715_v12 = vld [vmem:[#allocation6 + $0x90] sm:$0xf] }
  0x1d   :  { %v1919_v6 = vld [vmem:[#allocation6 + $0x228] sm:$0xf]  ;;  %v2319_v7 = vld [vmem:[#allocation6 + $0x230] sm:$0xf0]  ;;  %v1824_v8 = vor.u32 %v2295_v5, %v1823_v3  ;;  %v2268_v14 = vld [vmem:[#allocation6 + $0x98] sm:$0xf0] }
  0x1e   :  { %v1920_v9 = vor.u32 %v2319_v7, %v1919_v6  ;;  %v2015_v10 = vld [vmem:[#allocation6 + $0x2e8] sm:$0xf]  ;;  %v2343_v11 = vld [vmem:[#allocation6 + $0x2f0] sm:$0xf0]  ;;  %913 = vmatpush.bf16.msra.mxu0 %v1728_v4  ;;  %v1811_v15 = vld [vmem:[#allocation6 + $0x150] sm:$0xf]  ;;  %v1716_v17 = vor.u32 %v2268_v14, %v1715_v12 }
  0x1f   :  { %v2016_v13 = vor.u32 %v2343_v11, %v2015_v10  ;;  %v2292_v16 = vld [vmem:[#allocation6 + $0x158] sm:$0xf0]  ;;  %927 = vmatpush.bf16.msra.mxu1 %v1824_v8  ;;  %v1907_v19 = vld [vmem:[#allocation6 + $0x210] sm:$0xf]  ;;  %v1703_v24 = vld [vmem:[#allocation6 + $0x78] sm:$0xf] }
  0x20   :  { %941 = vmatpush.bf16.msra.mxu2 %v1920_v9  ;;  %v1812_v18 = vor.u32 %v2292_v16, %v1811_v15  ;;  %v2316_v20 = vld [vmem:[#allocation6 + $0x218] sm:$0xf0]  ;;  %v2003_v21 = vld [vmem:[#allocation6 + $0x2d0] sm:$0xf]  ;;  %v2265_v25 = vld [vmem:[#allocation6 + $0x80] sm:$0xf0] }
  0x21   :  { %955 = vmatpush.bf16.msra.mxu3 %v2016_v13  ;;  %v1908_v22 = vor.u32 %v2316_v20, %v1907_v19  ;;  %v2340_v23 = vld [vmem:[#allocation6 + $0x2d8] sm:$0xf0]  ;;  %v1799_v27 = vld [vmem:[#allocation6 + $0x138] sm:$0xf]  ;;  %v2289_v28 = vld [vmem:[#allocation6 + $0x140] sm:$0xf0]  ;;  %v1704_v30 = vor.u32 %v2265_v25, %v1703_v24 }
  0x22   :  { %v2004_v26 = vor.u32 %v2340_v23, %v2003_v21  ;;  %v1895_v29 = vld [vmem:[#allocation6 + $0x1f8] sm:$0xf]  ;;  %914 = vmatpush.bf16.msra.mxu0 %v1716_v17  ;;  %v2313_v31 = vld [vmem:[#allocation6 + $0x200] sm:$0xf0]  ;;  %v1800_v34 = vor.u32 %v2289_v28, %v1799_v27  ;;  %v1691_v36 = vld [vmem:[#allocation6 + $0x60] sm:$0xf] }
  0x23   :  { %v1991_v32 = vld [vmem:[#allocation6 + $0x2b8] sm:$0xf]  ;;  %v2337_v33 = vld [vmem:[#allocation6 + $0x2c0] sm:$0xf0]  ;;  %928 = vmatpush.bf16.msra.mxu1 %v1812_v18  ;;  %v1896_v35 = vor.u32 %v2313_v31, %v1895_v29  ;;  %v2262_v37 = vld [vmem:[#allocation6 + $0x68] sm:$0xf0] }
  0x24   :  { %942 = vmatpush.bf16.msra.mxu2 %v1908_v22  ;;  %v1787_v38 = vld [vmem:[#allocation6 + $0x120] sm:$0xf]  ;;  %v1992_v39 = vor.u32 %v2337_v33, %v1991_v32  ;;  %v2286_v40 = vld [vmem:[#allocation6 + $0x128] sm:$0xf0]  ;;  %v1692_v45 = vor.u32 %v2262_v37, %v1691_v36  ;;  %v1679_v48 = vld [vmem:[#allocation6 + $0x48] sm:$0xf] }
  0x25   :  { %956 = vmatpush.bf16.msra.mxu3 %v2004_v26  ;;  %v1883_v41 = vld [vmem:[#allocation6 + $0x1e0] sm:$0xf]  ;;  %v2310_v42 = vld [vmem:[#allocation6 + $0x1e8] sm:$0xf0]  ;;  %v1788_v46 = vor.u32 %v2286_v40, %v1787_v38  ;;  %v2259_v49 = vld [vmem:[#allocation6 + $0x50] sm:$0xf0] }
  0x26   :  { %v1979_v43 = vld [vmem:[#allocation6 + $0x2a0] sm:$0xf]  ;;  %v2334_v44 = vld [vmem:[#allocation6 + $0x2a8] sm:$0xf0]  ;;  %915 = vmatpush.bf16.msra.mxu0 %v1704_v30  ;;  %v1884_v47 = vor.u32 %v2310_v42, %v1883_v41  ;;  %v1775_v50 = vld [vmem:[#allocation6 + $0x108] sm:$0xf]  ;;  %v1680_v57 = vor.u32 %v2259_v49, %v1679_v48 }
  0x27   :  { %929 = vmatpush.bf16.msra.mxu1 %v1800_v34  ;;  %v1980_v51 = vor.u32 %v2334_v44, %v1979_v43  ;;  %v2283_v52 = vld [vmem:[#allocation6 + $0x110] sm:$0xf0]  ;;  %v1871_v53 = vld [vmem:[#allocation6 + $0x1c8] sm:$0xf]  ;;  %v1667_v60 = vld [vmem:[#allocation6 + $0x30] sm:$0xf] }
  0x28   :  { %943 = vmatpush.bf16.msra.mxu2 %v1896_v35  ;;  %v2307_v54 = vld [vmem:[#allocation6 + $0x1d0] sm:$0xf0]  ;;  %v1967_v55 = vld [vmem:[#allocation6 + $0x288] sm:$0xf]  ;;  %v1776_v58 = vor.u32 %v2283_v52, %v1775_v50  ;;  %v2256_v61 = vld [vmem:[#allocation6 + $0x38] sm:$0xf0] }
  0x29   :  { %957 = vmatpush.bf16.msra.mxu3 %v1992_v39  ;;  %v2331_v56 = vld [vmem:[#allocation6 + $0x290] sm:$0xf0]  ;;  %v1872_v59 = vor.u32 %v2307_v54, %v1871_v53  ;;  %v1763_v62 = vld [vmem:[#allocation6 + $0xf0] sm:$0xf]  ;;  %v2280_v0 = vld [vmem:[#allocation6 + $0xf8] sm:$0xf0]  ;;  %v1668_v5 = vor.u32 %v2256_v61, %v1667_v60 }
  0x2a   :  { %916 = vmatpush.bf16.msra.mxu0 %v1692_v45  ;;  %v1968_v63 = vor.u32 %v2331_v56, %v1967_v55  ;;  %v1859_v1 = vld [vmem:[#allocation6 + $0x1b0] sm:$0xf]  ;;  %v2304_v2 = vld [vmem:[#allocation6 + $0x1b8] sm:$0xf0]  ;;  %v1655_v6 = vld [vmem:[#allocation6 + $0x18] sm:$0xf]  ;;  %v1764_v7 = vor.u32 %v2280_v0, %v1763_v62 }
  0x2b   :  { %930 = vmatpush.bf16.msra.mxu1 %v1788_v46  ;;  %v1955_v3 = vld [vmem:[#allocation6 + $0x270] sm:$0xf]  ;;  %v2328_v4 = vld [vmem:[#allocation6 + $0x278] sm:$0xf0]  ;;  %v1860_v8 = vor.u32 %v2304_v2, %v1859_v1  ;;  %v2253_v9 = vld [vmem:[#allocation6 + $0x20] sm:$0xf0] }
  0x2c   :  { %944 = vmatpush.bf16.msra.mxu2 %v1884_v47  ;;  %v1751_v10 = vld [vmem:[#allocation6 + $0xd8] sm:$0xf]  ;;  %v1956_v12 = vor.u32 %v2328_v4, %v1955_v3  ;;  %v2277_v13 = vld [vmem:[#allocation6 + $0xe0] sm:$0xf0]  ;;  %v1656_v19 = vor.u32 %v2253_v9, %v1655_v6  ;;  %v1643_v20 = vld [vmem:[#allocation6] sm:$0xf] }
  0x2d   :  { %958 = vmatpush.bf16.msra.mxu3 %v1980_v51  ;;  %v2677_v11 = vld [vmem:[#allocation6 + $0x378] sm:$0xff]  ;;  %v2301_v15 = vld [vmem:[#allocation6 + $0x1a0] sm:$0xf0]  ;;  %vm903_vm0 = vcmask 1043456   ;;  %v1752_v21 = vor.u32 %v2277_v13, %v1751_v10  ;;  %v2250_v23 = vld [vmem:[#allocation6 + $0x8] sm:$0xf0] }
  0x2e   :  { %917 = vmatpush.bf16.msra.mxu0 %v1680_v57  ;;  %v1847_v14 = vld [vmem:[#allocation6 + $0x198] sm:$0xf]  ;;  %v2325_v17 = vld [vmem:[#allocation6 + $0x260] sm:$0xf0]  ;;  %v671_v18 = vunpack.c.l.b16 %v2677_v11  ;;  %v1739_v24 = vld [vmem:[#allocation6 + $0xc0] sm:$0xf]  ;;  %v1644_v34 = vor.u32 %v2250_v23, %v1643_v20 }
  0x2f   :  { %931 = vmatpush.bf16.msra.mxu1 %v1776_v58  ;;  %v1943_v16 = vld [vmem:[#allocation6 + $0x258] sm:$0xf]  ;;  %v1848_v22 = vor.u32 %v2301_v15, %v1847_v14  ;;  %v2274_v25 = vld [vmem:[#allocation6 + $0xc8] sm:$0xf0]  ;;  %v1835_v27 = vld [vmem:[#allocation6 + $0x180] sm:$0xf] }
  0x30   :  { %945 = vmatpush.bf16.msra.mxu2 %v1872_v59  ;;  %v1944_v26 = vor.u32 %v2325_v17, %v1943_v16  ;;  %v2298_v28 = vld [vmem:[#allocation6 + $0x188] sm:$0xf0]  ;;  %v785_v30 = vpack.c.b16 %v671_v18, %v671_v18  ;;  %v1729_v31 = vld [vmem:[#allocation6 + $0xb4] sm:$0xf0]  ;;  %v1931_v35 = vld [vmem:[#allocation6 + $0x240] sm:$0xf]  ;;  %v1740_v38 = vor.u32 %v2274_v25, %v1739_v24 }
  0x31   :  { %959 = vmatpush.bf16.msra.mxu3 %v1968_v63  ;;  %v2270_v29 = vld [vmem:[#allocation6 + $0xac] sm:$0xf]  ;;  %v1825_v33 = vld [vmem:[#allocation6 + $0x174] sm:$0xf0]  ;;  %v1836_v39 = vor.u32 %v2298_v28, %v1835_v27  ;;  %v126_v41 = vld [vmem:[#allocation3] sm:$0xff]  ;;  %vm899_vm1 = vcmask 719872  }
  0x32   :  { %918 = vmatpush.bf16.msra.mxu0 %v1668_v5  ;;  %v2294_v32 = vld [vmem:[#allocation6 + $0x16c] sm:$0xf]  ;;  %v1921_v40 = vld [vmem:[#allocation6 + $0x234] sm:$0xf0]  ;;  %v1732_v43 = vor.u32 %v2270_v29, %v1729_v31  ;;  %v2075_v44 = vld [vmem:[#allocation6 + $0x360] sm:$0xf] }
  0x33   :  { %932 = vmatpush.bf16.msra.mxu1 %v1764_v7  ;;  %v2322_v36 = vld [vmem:[#allocation6 + $0x248] sm:$0xf0]  ;;  %v131_v42 = vld [vmem:[#allocation3 + $0x28] sm:$0xff]  ;;  %v905_v46 = vsel %vm903_vm0, %v785_v30, 0  ;;  %v1828_v47 = vor.u32 %v2294_v32, %v1825_v33  ;;  %v2267_v49 = vld [vmem:[#allocation6 + $0x94] sm:$0xf] }
  0x34   :  { %946 = vmatpush.bf16.msra.mxu2 %v1860_v8  ;;  %v2318_v37 = vld [vmem:[#allocation6 + $0x22c] sm:$0xf]  ;;  %v1932_v48 = vor.u32 %v2322_v36, %v1931_v35  ;;  %v1717_v50 = vld [vmem:[#allocation6 + $0x9c] sm:$0xf0]  ;;  %v2291_v52 = vld [vmem:[#allocation6 + $0x154] sm:$0xf]  ;;  %v2681_v54 = vpack.c.bf16 %v131_v42, %v126_v41 }
  0x35   :  { %960 = vmatpush.bf16.msra.mxu3 %v1956_v12  ;;  %v2358_v45 = vld [vmem:[#allocation6 + $0x368] sm:$0xf0]  ;;  %v1924_v51 = vor.u32 %v2318_v37, %v1921_v40  ;;  %v1813_v53 = vld [vmem:[#allocation6 + $0x15c] sm:$0xf0]  ;;  %v2315_v56 = vld [vmem:[#allocation6 + $0x214] sm:$0xf]  ;;  %v1720_v60 = vor.u32 %v2267_v49, %v1717_v50 }
  0x36   :  { %919 = vmatpush.bf16.msra.mxu0 %v1656_v19  ;;  %v128_v55 = vld [vmem:[#allocation3 + $0x10] sm:$0xff]  ;;  %v133_v58 = vld [vmem:[#allocation3 + $0x38] sm:$0xff]  ;;  %v2076_v59 = vor.u32 %v2358_v45, %v2075_v44  ;;  %v134_v0 = vld [vmem:[#allocation3 + $0x40] sm:$0xff]  ;;  %v1816_v1 = vor.u32 %v2291_v52, %v1813_v53  ;;  %vm1584_vm2 = vcmask 130048   ;;  %vm1608_vm3 = vcmask 58368   ;;  %s1629_s29 = sshll.u32 %s2760_s13, 4  ;;  %s1630_s29 = int_to_ptr.hbm [resolvable:$true] %s1629_s29 }
  0x37   :  { %933 = vmatpush.bf16.msra.mxu1 %v1752_v21  ;;  %v1909_v57 = vld [vmem:[#allocation6 + $0x21c] sm:$0xf0]  ;;  %v2063_v61 = vld [vmem:[#allocation6 + $0x348] sm:$0xf]  ;;  %v2683_v62 = vpack.c.bf16 %v133_v58, %v128_v55  ;;  %v2355_v2 = vld [vmem:[#allocation6 + $0x350] sm:$0xf0]  ;;  %v672_v58 = vunpack.c.h.b16 %v2677_v11 }
  0x38   :  { %947 = vmatpush.bf16.msra.mxu2 %v1848_v22  ;;  %v129_v63 = vld [vmem:[#allocation3 + $0x18] sm:$0xff]  ;;  %v2264_v3 = vld [vmem:[#allocation6 + $0x7c] sm:$0xf]  ;;  %v1912_v6 = vor.u32 %v2315_v56, %v1909_v57  ;;  %v132_v13 = vld [vmem:[#allocation3 + $0x30] sm:$0xff]  ;;  %v2064_v14 = vor.u32 %v2355_v2, %v2063_v61 }
  0x39   :  { %961 = vmatpush.bf16.msra.mxu3 %v1944_v26  ;;  %v1705_v4 = vld [vmem:[#allocation6 + $0x84] sm:$0xf0]  ;;  %v2685_v5 = vpack.c.bf16 %v134_v0, %v129_v63  ;;  %v2288_v7 = vld [vmem:[#allocation6 + $0x13c] sm:$0xf]  ;;  %v2051_v16 = vld [vmem:[#allocation6 + $0x330] sm:$0xf] }
  0x3a   :  { %920 = vmatpush.bf16.msra.mxu0 %v1644_v34  ;;  %v1801_v8 = vld [vmem:[#allocation6 + $0x144] sm:$0xf0]  ;;  %v127_v9 = vld [vmem:[#allocation3 + $0x8] sm:$0xff]  ;;  %v1708_v15 = vor.u32 %v2264_v3, %v1705_v4  ;;  %v2261_v20 = vld [vmem:[#allocation6 + $0x64] sm:$0xf] }
  0x3b   :  { %934 = vmatpush.bf16.msra.mxu1 %v1740_v38  ;;  %v2312_v10 = vld [vmem:[#allocation6 + $0x1fc] sm:$0xf]  ;;  %v1897_v12 = vld [vmem:[#allocation6 + $0x204] sm:$0xf0]  ;;  %v2689_v17 = vpack.c.bf16 %v132_v13, %v127_v9  ;;  %v1804_v18 = vor.u32 %v2288_v7, %v1801_v8  ;;  %v1693_v21 = vld [vmem:[#allocation6 + $0x6c] sm:$0xf0] }
  0x3c   :  { %948 = vmatpush.bf16.msra.mxu2 %v1836_v39  ;;  %v2352_v19 = vld [vmem:[#allocation6 + $0x338] sm:$0xf0]  ;;  %v1900_v22 = vor.u32 %v2312_v10, %v1897_v12  ;;  %v2285_v23 = vld [vmem:[#allocation6 + $0x124] sm:$0xf]  ;;  %v1789_v24 = vld [vmem:[#allocation6 + $0x12c] sm:$0xf0]  ;;  %v1696_v28 = vor.u32 %v2261_v20, %v1693_v21 }
  0x3d   :  { %962 = vmatpush.bf16.msra.mxu3 %v1932_v48  ;;  %921 = vmatmul.bf16.vlgmr.msra.gmra.mxu0 %v2681_v54  ;;  %v2309_v25 = vld [vmem:[#allocation6 + $0x1e4] sm:$0xf]  ;;  %v1885_v26 = vld [vmem:[#allocation6 + $0x1ec] sm:$0xf0]  ;;  %v2052_v27 = vor.u32 %v2352_v19, %v2051_v16  ;;  %v2039_v29 = vld [vmem:[#allocation6 + $0x318] sm:$0xf]  ;;  %v1792_v30 = vor.u32 %v2285_v23, %v1789_v24 }
  0x3e   :  { %971 = vmatpush.bf16.msrb.mxu0 %v905_v46  ;;  %935 = vmatmul.bf16.vlgmr.msra.gmra.mxu1 %v2689_v17  ;;  %v2349_v31 = vld [vmem:[#allocation6 + $0x320] sm:$0xf0]  ;;  %v2258_v32 = vld [vmem:[#allocation6 + $0x4c] sm:$0xf]  ;;  %v1681_v33 = vld [vmem:[#allocation6 + $0x54] sm:$0xf0]  ;;  %v1888_v34 = vor.u32 %v2309_v25, %v1885_v26 }
  0x3f   :  { %983 = vmatpush.bf16.msrb.mxu1 %v1732_v43  ;;  %949 = vmatmul.bf16.vlgmr.msra.gmra.mxu2 %v2683_v62  ;;  %v2282_v35 = vld [vmem:[#allocation6 + $0x10c] sm:$0xf]  ;;  %v1777_v36 = vld [vmem:[#allocation6 + $0x114] sm:$0xf0]  ;;  %v2040_v39 = vor.u32 %v2349_v31, %v2039_v29  ;;  %v1684_v40 = vor.u32 %v2258_v32, %v1681_v33  ;;  %v2027_v41 = vld [vmem:[#allocation6 + $0x300] sm:$0xf] }
  0x40   :  { %997 = vmatpush.bf16.msrb.mxu2 %v1828_v47  ;;  %963 = vmatmul.bf16.vlgmr.msra.gmra.mxu3 %v2685_v5  ;;  %v2306_v37 = vld [vmem:[#allocation6 + $0x1cc] sm:$0xf]  ;;  %v1873_v38 = vld [vmem:[#allocation6 + $0x1d4] sm:$0xf0]  ;;  %v1780_v43 = vor.u32 %v2282_v35, %v1777_v36  ;;  %v2255_v44 = vld [vmem:[#allocation6 + $0x34] sm:$0xf] }
  0x41   :  { %1011 = vmatpush.bf16.msrb.mxu3 %v1924_v51  ;;  %v2346_v42 = vld [vmem:[#allocation6 + $0x308] sm:$0xf0]  ;;  %v1669_v45 = vld [vmem:[#allocation6 + $0x3c] sm:$0xf0]  ;;  %v2279_v46 = vld [vmem:[#allocation6 + $0xf4] sm:$0xf]  ;;  %v1876_v47 = vor.u32 %v2306_v37, %v1873_v38 }
  0x42   :  { %972 = vmatpush.bf16.msrb.mxu0 %v2076_v59  ;;  %v1765_v48 = vld [vmem:[#allocation6 + $0xfc] sm:$0xf0]  ;;  %v2342_v49 = vld [vmem:[#allocation6 + $0x2ec] sm:$0xf]  ;;  %v2017_v50 = vld [vmem:[#allocation6 + $0x2f4] sm:$0xf0]  ;;  %v2028_v53 = vor.u32 %v2346_v42, %v2027_v41  ;;  %v1672_v55 = vor.u32 %v2255_v44, %v1669_v45 }
  0x43   :  { %984 = vmatpush.bf16.msrb.mxu1 %v1720_v60  ;;  %v2303_v51 = vld [vmem:[#allocation6 + $0x1b4] sm:$0xf]  ;;  %v1861_v52 = vld [vmem:[#allocation6 + $0x1bc] sm:$0xf0]  ;;  %v135_v57 = vld [vmem:[#allocation3 + $0x48] sm:$0xff]  ;;  %v1768_v59 = vor.u32 %v2279_v46, %v1765_v48  ;;  %v2020_v60 = vor.u32 %v2342_v49, %v2017_v50 }
  0x44   :  { %998 = vmatpush.bf16.msrb.mxu2 %v1816_v1  ;;  %v130_v56 = vld [vmem:[#allocation3 + $0x20] sm:$0xff]  ;;  %v2252_v61 = vld [vmem:[#allocation6 + $0x1c] sm:$0xf]  ;;  %v1657_v63 = vld [vmem:[#allocation6 + $0x24] sm:$0xf0]  ;;  %v1864_v1 = vor.u32 %v2303_v51, %v1861_v52 }
  0x45   :  { %1012 = vmatpush.bf16.msrb.mxu3 %v1912_v6  ;;  %v2276_v0 = vld [vmem:[#allocation6 + $0xdc] sm:$0xf]  ;;  %v1753_v2 = vld [vmem:[#allocation6 + $0xe4] sm:$0xf0]  ;;  %v2339_v3 = vld [vmem:[#allocation6 + $0x2d4] sm:$0xf]  ;;  %v2694_v6 = vpack.c.bf16 %v135_v57, %v130_v56  ;;  %v1660_v9 = vor.u32 %v2252_v61, %v1657_v63 }
  0x46   :  { %973 = vmatpush.bf16.msrb.mxu0 %v2064_v14  ;;  %v2005_v4 = vld [vmem:[#allocation6 + $0x2dc] sm:$0xf0]  ;;  %v2300_v7 = vld [vmem:[#allocation6 + $0x19c] sm:$0xf]  ;;  %v1849_v8 = vld [vmem:[#allocation6 + $0x1a4] sm:$0xf0]  ;;  %v1756_v11 = vor.u32 %v2276_v0, %v1753_v2 }
  0x47   :  { %985 = vmatpush.bf16.msrb.mxu1 %v1708_v15  ;;  %v2008_v10 = vor.u32 %v2339_v3, %v2005_v4  ;;  %v2249_v12 = vld [vmem:[#allocation6 + $0x4] sm:$0xf]  ;;  %v1645_v13 = vld [vmem:[#allocation6 + $0xc] sm:$0xf0]  ;;  %v786_v15 = vpack.c.b16 %v672_v58, %v672_v58  ;;  %v1852_v16 = vor.u32 %v2300_v7, %v1849_v8  ;;  %v2336_v19 = vld [vmem:[#allocation6 + $0x2bc] sm:$0xf] }
  0x48   :  { %999 = vmatpush.bf16.msrb.mxu2 %v1804_v18  ;;  %v2273_v14 = vld [vmem:[#allocation6 + $0xc4] sm:$0xf]  ;;  %v1741_v18 = vld [vmem:[#allocation6 + $0xcc] sm:$0xf0]  ;;  %v1993_v20 = vld [vmem:[#allocation6 + $0x2c4] sm:$0xf0]  ;;  %v1648_v23 = vor.u32 %v2249_v12, %v1645_v13 }
  0x49   :  { %1013 = vmatpush.bf16.msrb.mxu3 %v1900_v22  ;;  %v1735_v21 = vld [vmem:[#allocation6 + $0xb0] sm:$0xf]  ;;  %v2272_v22 = vld [vmem:[#allocation6 + $0xb8] sm:$0xf0]  ;;  %v2297_v24 = vld [vmem:[#allocation6 + $0x184] sm:$0xf]  ;;  %v1744_v26 = vor.u32 %v2273_v14, %v1741_v18 }
  0x4a   :  { %974 = vmatpush.bf16.msrb.mxu0 %v2052_v27  ;;  %v1837_v25 = vld [vmem:[#allocation6 + $0x18c] sm:$0xf0]  ;;  %v1996_v27 = vor.u32 %v2336_v19, %v1993_v20  ;;  %v1736_v31 = vor.u32 %v2272_v22, %v1735_v21  ;;  %v2333_v32 = vld [vmem:[#allocation6 + $0x2a4] sm:$0xf]  ;;  %v1723_v37 = vld [vmem:[#allocation6 + $0x98] sm:$0xf] }
  0x4b   :  { %986 = vmatpush.bf16.msrb.mxu1 %v1696_v28  ;;  %v908_v28 = vsel %vm903_vm0, %v786_v15, 0  ;;  %v1831_v29 = vld [vmem:[#allocation6 + $0x170] sm:$0xf]  ;;  %v1840_v35 = vor.u32 %v2297_v24, %v1837_v25  ;;  %v2269_v38 = vld [vmem:[#allocation6 + $0xa0] sm:$0xf0] }
  0x4c   :  { %1000 = vmatpush.bf16.msrb.mxu2 %v1792_v30  ;;  %v2296_v30 = vld [vmem:[#allocation6 + $0x178] sm:$0xf0]  ;;  %v1981_v33 = vld [vmem:[#allocation6 + $0x2ac] sm:$0xf0]  ;;  %v1819_v41 = vld [vmem:[#allocation6 + $0x158] sm:$0xf]  ;;  %v1724_v44 = vor.u32 %v2269_v38, %v1723_v37 }
  0x4d   :  { %1014 = vmatpush.bf16.msrb.mxu3 %v1888_v34  ;;  %v2357_v34 = vld [vmem:[#allocation6 + $0x364] sm:$0xf]  ;;  %v2077_v36 = vld [vmem:[#allocation6 + $0x36c] sm:$0xf0]  ;;  %v2330_v45 = vld [vmem:[#allocation6 + $0x28c] sm:$0xf] }
  0x4e   :  { %975 = vmatpush.bf16.msrb.mxu0 %v2040_v39  ;;  %v1832_v39 = vor.u32 %v2296_v30, %v1831_v29  ;;  %v2293_v42 = vld [vmem:[#allocation6 + $0x160] sm:$0xf0]  ;;  %v1969_v46 = vld [vmem:[#allocation6 + $0x294] sm:$0xf0]  ;;  %v1711_v49 = vld [vmem:[#allocation6 + $0x80] sm:$0xf] }
  0x4f   :  { %987 = vmatpush.bf16.msrb.mxu1 %v1684_v40  ;;  %v1984_v40 = vor.u32 %v2333_v32, %v1981_v33  ;;  %v2065_v48 = vld [vmem:[#allocation6 + $0x354] sm:$0xf0]  ;;  %v2266_v50 = vld [vmem:[#allocation6 + $0x88] sm:$0xf0]  ;;  %v1820_v51 = vor.u32 %v2293_v42, %v1819_v41  ;;  %v1972_v52 = vor.u32 %v2330_v45, %v1969_v46  ;;  %v2327_v58 = vld [vmem:[#allocation6 + $0x274] sm:$0xf] }
  0x50   :  { %1001 = vmatpush.bf16.msrb.mxu2 %v1780_v43  ;;  %v2080_v43 = vor.u32 %v2357_v34, %v2077_v36  ;;  %v1712_v57 = vor.u32 %v2266_v50, %v1711_v49  ;;  %v2053_v61 = vld [vmem:[#allocation6 + $0x33c] sm:$0xf0]  ;;  %v1699_v63 = vld [vmem:[#allocation6 + $0x68] sm:$0xf]  ;;  %v2263_v0 = vld [vmem:[#allocation6 + $0x70] sm:$0xf0] }
  0x51   :  { %1015 = vmatpush.bf16.msrb.mxu3 %v1876_v47  ;;  %v2354_v47 = vld [vmem:[#allocation6 + $0x34c] sm:$0xf]  ;;  %v1795_v3 = vld [vmem:[#allocation6 + $0x128] sm:$0xf]  ;;  %v2287_v4 = vld [vmem:[#allocation6 + $0x130] sm:$0xf0]  ;;  %v1700_v8 = vor.u32 %v2263_v0, %v1699_v63 }
  0x52   :  { %976 = vmatpush.bf16.msrb.mxu0 %v2028_v53  ;;  %v1807_v53 = vld [vmem:[#allocation6 + $0x140] sm:$0xf]  ;;  %v2068_v56 = vor.u32 %v2354_v47, %v2065_v48  ;;  %v2041_v12 = vld [vmem:[#allocation6 + $0x324] sm:$0xf0]  ;;  %v1687_v13 = vld [vmem:[#allocation6 + $0x50] sm:$0xf]  ;;  %v1796_v15 = vor.u32 %v2287_v4, %v1795_v3 }
  0x53   :  { %988 = vmatpush.bf16.msrb.mxu1 %v1672_v55  ;;  %v2290_v55 = vld [vmem:[#allocation6 + $0x148] sm:$0xf0]  ;;  %v2260_v14 = vld [vmem:[#allocation6 + $0x58] sm:$0xf0]  ;;  %v2321_v19 = vld [vmem:[#allocation6 + $0x244] sm:$0xf] }
  0x54   :  { %1002 = vmatpush.bf16.msrb.mxu2 %v1768_v59  ;;  %v1957_v59 = vld [vmem:[#allocation6 + $0x27c] sm:$0xf0]  ;;  %v2284_v18 = vld [vmem:[#allocation6 + $0x118] sm:$0xf0]  ;;  %v1933_v21 = vld [vmem:[#allocation6 + $0x24c] sm:$0xf0]  ;;  %v1688_v25 = vor.u32 %v2260_v14, %v1687_v13 }
  0x55   :  { %1016 = vmatpush.bf16.msrb.mxu3 %v1864_v1  ;;  %2085 = vmatmul.msk.bf16.vlgmr.msrb.gmra.mxu0 %vm899_vm1, %v2694_v6  ;;  %v1808_v1 = vor.u32 %v2290_v55, %v1807_v53  ;;  %v1960_v2 = vor.u32 %v2327_v58, %v1957_v59  ;;  %v2345_v22 = vld [vmem:[#allocation6 + $0x304] sm:$0xf]  ;;  %v2320_v29 = vld [vmem:[#allocation6 + $0x238] sm:$0xf0]  ;;  %v1936_v33 = vor.u32 %v2321_v19, %v1933_v21  ;;  %v1771_v34 = vld [vmem:[#allocation6 + $0xf8] sm:$0xf] }
  0x56   :  { %1025 = vmatpush.bf16.msra.mxu0 %v2020_v60  ;;  %v2351_v60 = vld [vmem:[#allocation6 + $0x334] sm:$0xf]  ;;  %v2344_v32 = vld [vmem:[#allocation6 + $0x2f8] sm:$0xf0]  ;;  %v290_v38 = vld [vmem:[#allocation6 + $0x380] sm:$0xf] }
  0x57   :  { %989 = vmatpush.bf16.msrb.mxu1 %v1660_v9  ;;  %v2056_v7 = vor.u32 %v2351_v60, %v2053_v61  ;;  %v2324_v9 = vld [vmem:[#allocation6 + $0x25c] sm:$0xf]  ;;  %v1663_v41 = vld [vmem:[#allocation6 + $0x20] sm:$0xf]  ;;  %v2254_v42 = vld [vmem:[#allocation6 + $0x28] sm:$0xf0]  ;;  %v673_v50 = vunpack.c.l.b16 %v290_v38 }
  0x58   :  { %1003 = vmatpush.bf16.msrb.mxu2 %v1756_v11  ;;  %v1945_v11 = vld [vmem:[#allocation6 + $0x264] sm:$0xf0]  ;;  %v2317_v45 = vld [vmem:[#allocation6 + $0x220] sm:$0xf0]  ;;  %v2011_v46 = vld [vmem:[#allocation6 + $0x2d8] sm:$0xf] }
  0x59   :  { %1017 = vmatpush.bf16.msrb.mxu3 %v1852_v16  ;;  %v1783_v16 = vld [vmem:[#allocation6 + $0x110] sm:$0xf]  ;;  %v1948_v20 = vor.u32 %v2324_v9, %v1945_v11  ;;  %v2341_v47 = vld [vmem:[#allocation6 + $0x2e0] sm:$0xf0]  ;;  %v1759_v48 = vld [vmem:[#allocation6 + $0xe0] sm:$0xf]  ;;  %v787_v63 = vpack.c.b16 %v673_v50, %v673_v50 }
  0x5a   :  { %1026 = vmatpush.bf16.msra.mxu0 %v2008_v10  ;;  %v2348_v10 = vld [vmem:[#allocation6 + $0x31c] sm:$0xf]  ;;  %v1784_v30 = vor.u32 %v2284_v18, %v1783_v16  ;;  %v2278_v49 = vld [vmem:[#allocation6 + $0xe8] sm:$0xf0]  ;;  %v2012_v53 = vor.u32 %v2341_v47, %v2011_v46  ;;  %v1651_v55 = vld [vmem:[#allocation6 + $0x8] sm:$0xf] }
  0x5b   :  { %990 = vmatpush.bf16.msrb.mxu1 %v1648_v23  ;;  %v2029_v23 = vld [vmem:[#allocation6 + $0x30c] sm:$0xf0]  ;;  %v2044_v24 = vor.u32 %v2348_v10, %v2041_v12  ;;  %v1760_v58 = vor.u32 %v2278_v49, %v1759_v48  ;;  %v2314_v59 = vld [vmem:[#allocation6 + $0x208] sm:$0xf0]  ;;  %v1999_v60 = vld [vmem:[#allocation6 + $0x2c0] sm:$0xf] }
  0x5c   :  { %1004 = vmatpush.bf16.msrb.mxu2 %v1744_v26  ;;  %v1675_v26 = vld [vmem:[#allocation6 + $0x38] sm:$0xf]  ;;  %v2032_v36 = vor.u32 %v2345_v22, %v2029_v23  ;;  %v2338_v61 = vld [vmem:[#allocation6 + $0x2c8] sm:$0xf0]  ;;  %v1747_v0 = vld [vmem:[#allocation6 + $0xc8] sm:$0xf] }
  0x5d   :  { %1018 = vmatpush.bf16.msrb.mxu3 %v1840_v35  ;;  %v2281_v35 = vld [vmem:[#allocation6 + $0x100] sm:$0xf0]  ;;  %v2000_v4 = vor.u32 %v2338_v61, %v1999_v60  ;;  %v2311_v9 = vld [vmem:[#allocation6 + $0x1f0] sm:$0xf0]  ;;  %v1987_v11 = vld [vmem:[#allocation6 + $0x2a8] sm:$0xf] }
  0x5e   :  { %1027 = vmatpush.bf16.msra.mxu0 %v1996_v27  ;;  %991 = vmatmul.bf16.vlgmr.msrb.gmra.mxu1 %v2681_v54  ;;  %v2257_v27 = vld [vmem:[#allocation6 + $0x40] sm:$0xf0]  ;;  %v2335_v10 = vld [vmem:[#allocation6 + $0x2b0] sm:$0xf0]  ;;  %v911_v12 = vsel %vm903_vm0, %v787_v63, 0  ;;  %v2361_v60 = vld [vmem:[#allocation8 + $0x8] sm:$0xff] }
  0x5f   :  { %1041 = vmatpush.bf16.msra.mxu1 %v908_v28  ;;  %1005 = vmatmul.bf16.vlgmr.msrb.gmra.mxu2 %v2689_v17  ;;  %v1927_v28 = vld [vmem:[#allocation6 + $0x230] sm:$0xf]  ;;  %v1676_v37 = vor.u32 %v2257_v27, %v1675_v26  ;;  %v2083_v13 = vld [vmem:[#allocation6 + $0x368] sm:$0xf]  ;;  %v2359_v14 = vld [vmem:[#allocation6 + $0x370] sm:$0xf0]  ;;  %v1988_v16 = vor.u32 %v2335_v10, %v1987_v11 }
  0x60   :  { %1053 = vmatpush.bf16.msra.mxu2 %v1736_v31  ;;  %1019 = vmatmul.bf16.vlgmr.msrb.gmra.mxu3 %v2683_v62  ;;  %v2023_v31 = vld [vmem:[#allocation6 + $0x2f0] sm:$0xf]  ;;  %v2084_v18 = vor.u32 %v2359_v14, %v2083_v13  ;;  %v2332_v22 = vld [vmem:[#allocation6 + $0x298] sm:$0xf0]  ;;  %v2326_v38 = vld [vmem:[#allocation6 + $0x268] sm:$0xf0] }
  0x61   :  { %1067 = vmatpush.bf16.msra.mxu3 %v1832_v39  ;;  %v1928_v39 = vor.u32 %v2320_v29, %v1927_v28  ;;  %v1879_v19 = vld [vmem:[#allocation6 + $0x1d0] sm:$0xf]  ;;  %v1867_v28 = vld [vmem:[#allocation6 + $0x1b8] sm:$0xf]  ;;  %v2305_v29 = vld [vmem:[#allocation6 + $0x1c0] sm:$0xf0] }
  0x62   :  { %1028 = vmatpush.bf16.msra.mxu0 %v1984_v40  ;;  %v2024_v40 = vor.u32 %v2344_v32, %v2023_v31  ;;  %v1975_v21 = vld [vmem:[#allocation6 + $0x290] sm:$0xf]  ;;  %v2329_v31 = vld [vmem:[#allocation6 + $0x280] sm:$0xf0]  ;;  %v2059_v32 = vld [vmem:[#allocation6 + $0x338] sm:$0xf] }
  0x63   :  { %1042 = vmatpush.bf16.msra.mxu1 %v2080_v43  ;;  %v1915_v43 = vld [vmem:[#allocation6 + $0x218] sm:$0xf]  ;;  %v2071_v23 = vld [vmem:[#allocation6 + $0x350] sm:$0xf]  ;;  %v1976_v26 = vor.u32 %v2332_v22, %v1975_v21  ;;  %v1939_v46 = vld [vmem:[#allocation6 + $0x248] sm:$0xf] }
  0x64   :  { %1054 = vmatpush.bf16.msra.mxu2 %v1724_v44  ;;  %v1772_v44 = vor.u32 %v2281_v35, %v1771_v34  ;;  %v1868_v34 = vor.u32 %v2305_v29, %v1867_v28  ;;  %v2323_v47 = vld [vmem:[#allocation6 + $0x250] sm:$0xf0]  ;;  %v2035_v48 = vld [vmem:[#allocation6 + $0x308] sm:$0xf] }
  0x65   :  { %1068 = vmatpush.bf16.msra.mxu3 %v1820_v51  ;;  %v1664_v51 = vor.u32 %v2254_v42, %v1663_v41  ;;  %v2347_v49 = vld [vmem:[#allocation6 + $0x310] sm:$0xf0]  ;;  %v2360_v61 = vld [vmem:[#allocation8] sm:$0xff] }
  0x66   :  { %1029 = vmatpush.bf16.msra.mxu0 %v1972_v52  ;;  %v1916_v52 = vor.u32 %v2317_v45, %v1915_v43  ;;  %v2299_v45 = vld [vmem:[#allocation6 + $0x190] sm:$0xf0]  ;;  %v2372_v10 = vld [vmem:[#allocation8 + $0x60] sm:$0xff] }
  0x67   :  { %1043 = vmatpush.bf16.msra.mxu1 %v2068_v56  ;;  %v2251_v56 = vld [vmem:[#allocation6 + $0x10] sm:$0xf0] }
  0x68   :  { %1055 = vmatpush.bf16.msra.mxu2 %v1712_v57  ;;  %v1903_v57 = vld [vmem:[#allocation6 + $0x200] sm:$0xf]  ;;  %v2370_v22 = vld [vmem:[#allocation8 + $0x50] sm:$0xff] }
  0x69   :  { %1069 = vmatpush.bf16.msra.mxu3 %v1808_v1  ;;  %v2275_v1 = vld [vmem:[#allocation6 + $0xd0] sm:$0xf0]  ;;  %v1904_v3 = vor.u32 %v2314_v59, %v1903_v57  ;;  %v2364_v57 = vld [vmem:[#allocation8 + $0x20] sm:$0xff] }
  0x6a   :  { %1030 = vmatpush.bf16.msra.mxu0 %v1960_v2  ;;  %v1652_v2 = vor.u32 %v2251_v56, %v1651_v55  ;;  %v2366_v55 = vld [vmem:[#allocation8 + $0x30] sm:$0xff]  ;;  %v2365_v56 = vld [vmem:[#allocation8 + $0x28] sm:$0xff] }
  0x6b   :  { %1044 = vmatpush.bf16.msra.mxu1 %v2056_v7  ;;  %v1891_v7 = vld [vmem:[#allocation6 + $0x1e8] sm:$0xf]  ;;  %v2362_v59 = vld [vmem:[#allocation8 + $0x10] sm:$0xff] }
  0x6c   :  { %1056 = vmatpush.bf16.msra.mxu2 %v1700_v8  ;;  %v1748_v8 = vor.u32 %v2275_v1, %v1747_v0  ;;  %v2374_v1 = vld [vmem:[#allocation8 + $0x70] sm:$0xff] }
  0x6d   :  { %1070 = vmatpush.bf16.msra.mxu3 %v1796_v15  ;;  %v1892_v15 = vor.u32 %v2311_v9, %v1891_v7 }
  0x6e   :  { %1031 = vmatpush.bf16.msra.mxu0 %v1948_v20  ;;  %v2308_v20 = vld [vmem:[#allocation6 + $0x1d8] sm:$0xf0] }
  0x6f   :  { %1045 = vmatpush.bf16.msra.mxu1 %v2044_v24  ;;  %v2356_v24 = vld [vmem:[#allocation6 + $0x358] sm:$0xf0] }
  0x70   :  { %1057 = vmatpush.bf16.msra.mxu2 %v1688_v25  ;;  %v1880_v25 = vor.u32 %v2308_v20, %v1879_v19  ;;  %v2072_v27 = vor.u32 %v2356_v24, %v2071_v23 }
  0x71   :  { %1071 = vmatpush.bf16.msra.mxu3 %v1784_v30  ;;  %v1963_v30 = vld [vmem:[#allocation6 + $0x278] sm:$0xf] }
  0x72   :  { %1032 = vmatpush.bf16.msra.mxu0 %v1936_v33  ;;  %v2353_v33 = vld [vmem:[#allocation6 + $0x340] sm:$0xf0] }
  0x73   :  { %1046 = vmatpush.bf16.msra.mxu1 %v2032_v36  ;;  %v2060_v35 = vor.u32 %v2353_v33, %v2059_v32  ;;  %v1855_v36 = vld [vmem:[#allocation6 + $0x1a0] sm:$0xf] }
  0x74   :  { %1058 = vmatpush.bf16.msra.mxu2 %v1676_v37  ;;  %v1951_v37 = vld [vmem:[#allocation6 + $0x260] sm:$0xf] }
  0x75   :  { %1072 = vmatpush.bf16.msra.mxu3 %v1772_v44  ;;  %1033 = vmatmul.bf16.vlgmr.msra.gmra.mxu0 %v2685_v5  ;;  %v1952_v42 = vor.u32 %v2326_v38, %v1951_v37  ;;  %v1843_v44 = vld [vmem:[#allocation6 + $0x188] sm:$0xf]  ;;  %v2383_v33 = vld [vmem:[#allocation8 + $0xb8] sm:$0xff]  ;;  %v2381_v38 = vld [vmem:[#allocation8 + $0xa8] sm:$0xff] }
  0x76   :  { %1081 = vmatpush.bf16.msrb.mxu0 %v1928_v39  ;;  %2086 = vmatmul.msk.bf16.vlgmr.msra.gmra.mxu1 %vm899_vm1, %v2694_v6  ;;  %v2047_v39 = vld [vmem:[#allocation6 + $0x320] sm:$0xf]  ;;  %v1844_v50 = vor.u32 %v2299_v45, %v1843_v44 }
  0x77   :  { %1095 = vmatpush.bf16.msrb.mxu1 %v2024_v40  ;;  %v2350_v40 = vld [vmem:[#allocation6 + $0x328] sm:$0xf0] }
  0x78   :  { %1059 = vmatpush.bf16.msra.mxu2 %v1664_v51  ;;  %v2048_v43 = vor.u32 %v2350_v40, %v2047_v39  ;;  %v1940_v51 = vor.u32 %v2323_v47, %v1939_v46 }
  0x79   :  { %1073 = vmatpush.bf16.msra.mxu3 %v1760_v58  ;;  %v2363_v58 = vld [vmem:[#allocation8 + $0x18] sm:$0xff] }
  0x7a   :  { %1082 = vmatpush.bf16.msrb.mxu0 %v1916_v52  ;;  %v2036_v52 = vor.u32 %v2347_v49, %v2035_v48  ;;  %v2379_v49 = vld [vmem:[#allocation8 + $0x98] sm:$0xff] }
  0x7b   :  { %1096 = vmatpush.bf16.msrb.mxu1 %v2012_v53  ;;  %v2367_v53 = vld [vmem:[#allocation8 + $0x38] sm:$0xff] }
  0x7c   :  { %1060 = vmatpush.bf16.msra.mxu2 %v1652_v2 }
  0x7d   :  { %1074 = vmatpush.bf16.msra.mxu3 %v1748_v8 }
  0x7e   :  { %1083 = vmatpush.bf16.msrb.mxu0 %v1904_v3 }
  0x7f   :  { %1097 = vmatpush.bf16.msrb.mxu1 %v2000_v4  ;;  %1061 = vmatmul.bf16.vlgmr.msra.gmra.mxu2 %v2681_v54  ;;  %v1964_v54 = vor.u32 %v2329_v31, %v1963_v30  ;;  %v2373_v4 = vld [vmem:[#allocation8 + $0x68] sm:$0xff]  ;;  %v2368_v31 = vld [vmem:[#allocation8 + $0x40] sm:$0xff] }
  0x80   :  { %1111 = vmatpush.bf16.msrb.mxu2 %v911_v12  ;;  %1075 = vmatmul.bf16.vlgmr.msra.gmra.mxu3 %v2689_v17  ;;  %v2302_v17 = vld [vmem:[#allocation6 + $0x1a8] sm:$0xf0] }
  0x81   :  { %v1856_v41 = vor.u32 %v2302_v17, %v1855_v36  ;;  %1328 = vmatpush.bf16.msrb.mxu3 %v2367_v53  ;;  %v2382_v17 = vld [vmem:[#allocation8 + $0xb0] sm:$0xff] }
  0x82   :  { %1084 = vmatpush.bf16.msrb.mxu0 %v1892_v15 }
  0x83   :  { %1098 = vmatpush.bf16.msrb.mxu1 %v1988_v16  ;;  %v2371_v16 = vld [vmem:[#allocation8 + $0x58] sm:$0xff] }
  0x84   :  { %1112 = vmatpush.bf16.msrb.mxu2 %v2084_v18 }
  0x85   :  { %1329 = vmatpush.bf16.msrb.mxu3 %v2366_v55 }
  0x86   :  { %1085 = vmatpush.bf16.msrb.mxu0 %v1880_v25  ;;  %v2369_v25 = vld [vmem:[#allocation8 + $0x48] sm:$0xff] }
  0x87   :  { %1099 = vmatpush.bf16.msrb.mxu1 %v1976_v26 }
  0x88   :  { %1113 = vmatpush.bf16.msrb.mxu2 %v2072_v27 }
  0x89   :  { %1330 = vmatpush.bf16.msrb.mxu3 %v2365_v56 }
  0x8a   :  { %1086 = vmatpush.bf16.msrb.mxu0 %v1868_v34 }
  0x8b   :  { %1100 = vmatpush.bf16.msrb.mxu1 %v1964_v54 }
  0x8c   :  { %1114 = vmatpush.bf16.msrb.mxu2 %v2060_v35 }
  0x8d   :  { %1331 = vmatpush.bf16.msrb.mxu3 %v2364_v57 }
  0x8e   :  { %1087 = vmatpush.bf16.msrb.mxu0 %v1856_v41 }
  0x8f   :  { %1101 = vmatpush.bf16.msrb.mxu1 %v1952_v42 }
  0x90   :  { %1115 = vmatpush.bf16.msrb.mxu2 %v2048_v43  ;;  %v2380_v43 = vld [vmem:[#allocation8 + $0xa0] sm:$0xff] }
  0x91   :  { %1332 = vmatpush.bf16.msrb.mxu3 %v2363_v58 }
  0x92   :  { %1088 = vmatpush.bf16.msrb.mxu0 %v1844_v50 }
  0x93   :  { %1102 = vmatpush.bf16.msrb.mxu1 %v1940_v51 }
  0x94   :  { %1116 = vmatpush.bf16.msrb.mxu2 %v2036_v52  ;;  %v2378_v52 = vld [vmem:[#allocation8 + $0x90] sm:$0xff] }
  0x95   :  { %1089 = vmatmul.bf16.vlgmr.msrb.gmra.mxu0 %v2683_v62  ;;  %1333 = vmatpush.bf16.msrb.mxu3 %v2362_v59  ;;  %v2377_v59 = vld [vmem:[#allocation8 + $0x88] sm:$0xff] }
  0x96   :  { %1103 = vmatmul.bf16.vlgmr.msrb.gmra.mxu1 %v2685_v5  ;;  %v2715_v5 = vld [vmem:[%s2749_s2] sm:$0x7] }
  0x97   :  { %2087 = vmatmul.msk.bf16.vlgmr.msrb.gmra.mxu2 %vm899_vm1, %v2694_v6  ;;  %v2375_v6 = vld [vmem:[#allocation8 + $0x78] sm:$0xff]  ;;  %v293_v0 = vperm.slane %v2715_v5, 0  ;;  %v294_v34 = vperm.slane %v2715_v5, 1  ;;  %1356 = vmatpush.bf16.msra.mxu1 %v2383_v33  ;;  %v2398_v33 = vld [vmem:[#allocation11 + $0x30] sm:$0xff] }
  0x98   :  { %1342 = vmatpush.bf16.msra.mxu0 %v2375_v6 }
  0x99   :  { %1334 = vmatpush.bf16.msrb.mxu3 %v2361_v60 }
  0x9b   :  { %1357 = vmatpush.bf16.msra.mxu1 %v2382_v17  ;;  %v2415_v17 = vld [vmem:[%s2751_s4] ss:$0 sm:$0xff] }
  0x9c   :  { %1343 = vmatpush.bf16.msra.mxu0 %v2374_v1 }
  0x9d   :  { %1335 = vmatpush.bf16.msrb.mxu3 %v2360_v61  ;;  %v2376_v61 = vld [vmem:[#allocation8 + $0x80] sm:$0xff] }
  0x9f   :  { %1358 = vmatpush.bf16.msra.mxu1 %v2381_v38 }
  0xa0   :  { %1344 = vmatpush.bf16.msra.mxu0 %v2373_v4 }
  0xa3   :  { %1359 = vmatpush.bf16.msra.mxu1 %v2380_v43 }
  0xa4   :  { %1345 = vmatpush.bf16.msra.mxu0 %v2372_v10 }
  0xa7   :  { %1360 = vmatpush.bf16.msra.mxu1 %v2379_v49 }
  0xa8   :  { %1346 = vmatpush.bf16.msra.mxu0 %v2371_v16 }
  0xab   :  { %1361 = vmatpush.bf16.msra.mxu1 %v2378_v52  ;;  %v2393_v52 = vld [vmem:[#allocation11 + $0x8] sm:$0xff] }
  0xac   :  { %1347 = vmatpush.bf16.msra.mxu0 %v2370_v22 }
  0xaf   :  { %1362 = vmatpush.bf16.msra.mxu1 %v2377_v59 }
  0xb0   :  { %1348 = vmatpush.bf16.msra.mxu0 %v2369_v25  ;;  %v2390_v25 = vld [vmem:[#allocation9 + $0x30] sm:$0xff] }
  0xb3   :  { %1363 = vmatpush.bf16.msra.mxu1 %v2376_v61 }
  0xb4   :  { %1349 = vmatpush.bf16.msra.mxu0 %v2368_v31  ;;  %v2384_v31 = vld [vmem:[#allocation9] sm:$0xff] }
  0xba   :  { %v922_v62 = vpop.f32.mrf.mxu0 }
  0xbb   :  { %v936_v63 = vpop.f32.mrf.mxu1  ;;  %v923_v3 = vadd.f32 %v922_v62, %v293_v0 }
  0xbd   :  { %v937_v11 = vadd.f32 %v936_v63, %v923_v3 }
  0xc2   :  { %v950_v2 = vpop.f32.mrf.mxu2  ;;  %v924_v7 = vpop.f32.mrf.mxu0 }
  0xc3   :  { %v964_v8 = vpop.f32.mrf.mxu3  ;;  %v925_v9 = vadd.f32 %v924_v7, %v293_v0  ;;  %v938_v12 = vpop.f32.mrf.mxu1  ;;  %v951_v13 = vadd.f32 %v950_v2, %v937_v11  ;;  %v295_v0 = vperm.slane %v2715_v5, 2 }
  0xc5   :  { %v939_v14 = vadd.f32 %v938_v12, %v925_v9  ;;  %v965_v19 = vadd.f32 %v964_v8, %v951_v13 }
  0xca   :  { %v952_v15 = vpop.f32.mrf.mxu2 }
  0xcb   :  { %v953_v20 = vadd.f32 %v952_v15, %v939_v14  ;;  %v966_v21 = vpop.f32.mrf.mxu3 }
  0xcd   :  { %v967_v24 = vadd.f32 %v966_v21, %v953_v20 }
  0xd2   :  { %v978_v18 = vpop.f32.mrf.mxu0 }
  0xd3   :  { %v979_v23 = vadd.f32 %v978_v18, %v965_v19 }
  0xd5   :  { %v1123_v27 = vmax.f32 %v979_v23, 0.0 }
  0xda   :  { %v980_v26 = vpop.f32.mrf.mxu0 }
  0xdb   :  { %v981_v28 = vadd.f32 %v980_v26, %v967_v24  ;;  %v992_v29 = vpop.f32.mrf.mxu1  ;;  %v2391_v24 = vld [vmem:[#allocation9 + $0x38] sm:$0xff]  ;;  %v2389_v26 = vld [vmem:[#allocation9 + $0x28] sm:$0xff] }
  0xdc   :  { %v993_v35 = vadd.f32 %v992_v29, %v294_v34  ;;  %1441 = vmatpush.bf16.msra.mxu2 %v2391_v24  ;;  %v2386_v29 = vld [vmem:[#allocation9 + $0x10] sm:$0xff] }
  0xdd   :  { %v1126_v30 = vmax.f32 %v981_v28, 0.0  ;;  %v2387_v28 = vld [vmem:[#allocation9 + $0x18] sm:$0xff] }
  0xdf   :  { %v1129_v32 = vpack.c.bf16 %v1126_v30, %v1123_v27  ;;  %v2388_v27 = vld [vmem:[#allocation9 + $0x20] sm:$0xff]  ;;  %v2385_v30 = vld [vmem:[#allocation9 + $0x8] sm:$0xff] }
  0xe0   :  { %1442 = vmatpush.bf16.msra.mxu2 %v2390_v25 }
  0xe1   :  { %1336 = vmatmul.bf16.vlgmr.msrb.gmra.mxu3 %v1129_v32  ;;  %v2399_v32 = vld [vmem:[#allocation11 + $0x38] sm:$0xff] }
  0xe2   :  { %v1006_v54 = vpop.f32.mrf.mxu2  ;;  %1526 = vmatpush.bf16.msra.mxu3 %v2399_v32 }
  0xe3   :  { %v994_v36 = vpop.f32.mrf.mxu1  ;;  %v1020_v37 = vpop.f32.mrf.mxu3  ;;  %v1007_v39 = vadd.f32 %v1006_v54, %v993_v35  ;;  %v2396_v35 = vld [vmem:[#allocation11 + $0x20] sm:$0xff] }
  0xe4   :  { %v995_v40 = vadd.f32 %v994_v36, %v294_v34  ;;  %1443 = vmatpush.bf16.msra.mxu2 %v2389_v26  ;;  %v2397_v34 = vld [vmem:[#allocation11 + $0x28] sm:$0xff] }
  0xe5   :  { %v1021_v42 = vadd.f32 %v1020_v37, %v1007_v39 }
  0xe6   :  { %1527 = vmatpush.bf16.msra.mxu3 %v2398_v33 }
  0xe8   :  { %1444 = vmatpush.bf16.msra.mxu2 %v2388_v27 }
  0xea   :  { %v1008_v41 = vpop.f32.mrf.mxu2  ;;  %1528 = vmatpush.bf16.msra.mxu3 %v2397_v34 }
  0xeb   :  { %v1009_v46 = vadd.f32 %v1008_v41, %v995_v40  ;;  %v1022_v47 = vpop.f32.mrf.mxu3 }
  0xec   :  { %1445 = vmatpush.bf16.msra.mxu2 %v2387_v28 }
  0xed   :  { %v1023_v50 = vadd.f32 %v1022_v47, %v1009_v46 }
  0xee   :  { %1529 = vmatpush.bf16.msra.mxu3 %v2396_v35 }
  0xf0   :  { %1446 = vmatpush.bf16.msra.mxu2 %v2386_v29 }
  0xf2   :  { %v1034_v44 = vpop.f32.mrf.mxu0 }
  0xf3   :  { %v1048_v45 = vpop.f32.mrf.mxu1  ;;  %v1035_v48 = vadd.f32 %v1034_v44, %v1021_v42 }
  0xf4   :  { %1447 = vmatpush.bf16.msra.mxu2 %v2385_v30 }
  0xf5   :  { %v1049_v51 = vadd.f32 %v1048_v45, %v1035_v48 }
  0xf7   :  { %v1124_v57 = vmax.f32 %v1049_v51, 0.0  ;;  %v2394_v51 = vld [vmem:[#allocation11 + $0x10] sm:$0xff] }
  0xf8   :  { %1448 = vmatpush.bf16.msra.mxu2 %v2384_v31 }
  0xfa   :  { %v1036_v53 = vpop.f32.mrf.mxu0 }
  0xfb   :  { %v1037_v55 = vadd.f32 %v1036_v53, %v1023_v50  ;;  %v1050_v56 = vpop.f32.mrf.mxu1  ;;  %v2395_v50 = vld [vmem:[#allocation11 + $0x18] sm:$0xff]  ;;  %v2392_v53 = vld [vmem:[#allocation11] sm:$0xff] }
  0xfc   :  { %1530 = vmatpush.bf16.msra.mxu3 %v2395_v50 }
  0xfd   :  { %v1051_v58 = vadd.f32 %v1050_v56, %v1037_v55  ;;  %v2416_v56 = vld [vmem:[%s2753_s6] ss:$0 sm:$0xff] }
  0xff   :  { %v1127_v60 = vmax.f32 %v1051_v58, 0.0 }
 0x100   :  { %1531 = vmatpush.bf16.msra.mxu3 %v2394_v51 }
 0x101   :  { %v1130_v62 = vpack.c.bf16 %v1127_v60, %v1124_v57 }
 0x102   :  { %v1062_v6 = vpop.f32.mrf.mxu2 }
 0x103   :  { %1350 = vmatmul.bf16.vlgmr.msra.gmra.mxu0 %v1130_v62  ;;  %v1076_v63 = vpop.f32.mrf.mxu3  ;;  %v1063_v3 = vadd.f32 %v1062_v6, %v295_v0 }
 0x104   :  { %1532 = vmatpush.bf16.msra.mxu3 %v2393_v52 }
 0x105   :  { %v1077_v9 = vadd.f32 %v1076_v63, %v1063_v3  ;;  %v2417_v63 = vld [vmem:[%s2755_s8] ss:$0 sm:$0xff] }
 0x106   :  { %v2418_v3 = vld [vmem:[%s2756_s9] ss:$0 sm:$0xff] }
 0x108   :  { %1533 = vmatpush.bf16.msra.mxu3 %v2392_v53 }
 0x10a   :  { %v1064_v1 = vpop.f32.mrf.mxu2 }
 0x10b   :  { %v1065_v7 = vadd.f32 %v1064_v1, %v295_v0  ;;  %v1078_v8 = vpop.f32.mrf.mxu3 }
 0x10d   :  { %v1079_v10 = vadd.f32 %v1078_v8, %v1065_v7 }
 0x112   :  { %v1090_v2 = vpop.f32.mrf.mxu0 }
 0x113   :  { %v1104_v4 = vpop.f32.mrf.mxu1  ;;  %v1091_v12 = vadd.f32 %v1090_v2, %v1077_v9 }
 0x115   :  { %v1105_v15 = vadd.f32 %v1104_v4, %v1091_v12 }
 0x11a   :  { %v1118_v11 = vpop.f32.mrf.mxu2  ;;  %v1092_v13 = vpop.f32.mrf.mxu0 }
 0x11b   :  { %v1093_v14 = vadd.f32 %v1092_v13, %v1079_v10  ;;  %v1106_v16 = vpop.f32.mrf.mxu1  ;;  %v1119_v18 = vadd.f32 %v1118_v11, %v1105_v15  ;;  %v2587_v11 = vmov 0   ;;  %v2419_v10 = vld [vmem:[#allocation2] ss:$0 sm:$0xff] }
 0x11c   :  { %2413 = vset.pattern.permute.xlu1 %v2587_v11  ;;  %2414 = vset.pattern.permute.xlu0 %v2587_v11 }
 0x11d   :  { %v1107_v19 = vadd.f32 %v1106_v16, %v1093_v14  ;;  %v1125_v22 = vmax.f32 %v1119_v18, 0.0  ;;  %v1570_v16 = vld [vmem:[%s2758_s11 + $0x8] sm:$0xff] }
 0x122   :  { %v1120_v20 = vpop.f32.mrf.mxu2 }
 0x123   :  { %v1121_v21 = vadd.f32 %v1120_v20, %v1107_v19  ;;  %v1569_v20 = vld [vmem:[%s2758_s11] sm:$0xff]  ;;  %s2588_s11 = smov [#allocation12]  }
 0x125   :  { %v1128_v5 = vmax.f32 %v1121_v21, 0.0 }
 0x127   :  { %v1131_v23 = vpack.c.bf16 %v1128_v5, %v1125_v22  ;;  %v1583_v5 = vld [vmem:[%s2759_s12] sm:$0x3]  ;;  %s1627_s12 = sshll.u32 %s2588_s11, 4  ;;  %s1628_s12 = int_to_ptr.vmem [resolvable:$true] %s1627_s12 }
 0x129   :  { %1364 = vmatmul.bf16.vlgmr.msra.gmra.mxu1 %v1131_v23 }
 0x164   :  { %v1337_v54 = vpop.f32.mrf.mxu3 }
 0x165   :  { %v1338_v39 = vadd.f32 %v2415_v17, %v1337_v54 }
 0x16c   :  { %v1339_v38 = vpop.f32.mrf.mxu3 }
 0x16d   :  { %v1340_v41 = vadd.f32 %v2415_v17, %v1339_v38 }
 0x180   :  { %v1351_v36 = vpop.f32.mrf.mxu0 }
 0x181   :  { %v1352_v42 = vadd.f32 %v1351_v36, %v1338_v39 }
 0x188   :  { %v1353_v40 = vpop.f32.mrf.mxu0 }
 0x189   :  { %v1354_v43 = vadd.f32 %v1353_v40, %v1340_v41 }
 0x1a6   :  { %v1365_v37 = vpop.f32.mrf.mxu1 }
 0x1a7   :  { %v1366_v44 = vadd.f32 %v1365_v37, %v1352_v42 }
 0x1a9   :  { %v1370_v47 = vmax.f32 %v1366_v44, 0.0 }
 0x1ae   :  { %v1367_v45 = vpop.f32.mrf.mxu1 }
 0x1af   :  { %v1368_v46 = vadd.f32 %v1367_v45, %v1354_v43 }
 0x1b1   :  { %v1371_v48 = vmax.f32 %v1368_v46, 0.0 }
 0x1b3   :  { %v1372_v49 = vpack.c.bf16 %v1371_v48, %v1370_v47 }
 0x1b5   :  { %1449 = vmatmul.bf16.vlgmr.msra.gmra.mxu2 %v1372_v49 }
 0x238   :  { %v1450_v55 = vpop.f32.mrf.mxu2 }
 0x239   :  { %v1451_v57 = vadd.f32 %v2416_v56, %v1450_v55 }
 0x23b   :  { %v1455_v60 = vmax.f32 %v1451_v57, 0.0 }
 0x240   :  { %v1452_v58 = vpop.f32.mrf.mxu2 }
 0x241   :  { %v1453_v59 = vadd.f32 %v2416_v56, %v1452_v58 }
 0x243   :  { %v1456_v62 = vmax.f32 %v1453_v59, 0.0 }
 0x245   :  { %v1457_v61 = vpack.c.bf16 %v1456_v62, %v1455_v60 }
 0x247   :  { %1534 = vmatmul.bf16.vlgmr.msra.gmra.mxu3 %v1457_v61 }
 0x2ca   :  { %v1535_v6 = vpop.f32.mrf.mxu3 }
 0x2cb   :  { %v1536_v4 = vadd.f32 %v2417_v63, %v1535_v6 }
 0x2cd   :  { %v1540_v8 = vmax.f32 %v1536_v4, 0.0 }
 0x2cf   :  { %v1546_v9 = vmul.f32 %v2418_v3, %v1540_v8 }
 0x2d2   :  { %v1537_v0 = vpop.f32.mrf.mxu3 }
 0x2d3   :  { %v1538_v1 = vadd.f32 %v2417_v63, %v1537_v0 }
 0x2d5   :  { %v1541_v2 = vmax.f32 %v1538_v1, 0.0 }
 0x2d7   :  { %v1547_v7 = vmul.f32 %v2418_v3, %v1541_v2 }
 0x2d9   :  { %1550 = vadd.xlane.f32.xlu0 %v1547_v7 }
 0x2e1   :  { %1548 = vadd.xlane.f32.xlu0 %v1546_v9 }
 0x34c   :  { %v1551_v12 = vpop.xlane.xlu0 %1550 }
 0x34d   :  { %v1557_v13 = vadd.f32 %v2419_v10, %v1551_v12 }
 0x34f   :  { %1578 = vperm.xlu1 %2413, %v1557_v13  }
 0x354   :  { %v1549_v14 = vpop.xlane.xlu0 %1548 }
 0x355   :  { %v1556_v15 = vadd.f32 %v2419_v10, %v1549_v14 }
 0x357   :  { %1573 = vperm.xlu1 %2413, %v1556_v15  }
 0x3c1   :  { %v1579_v18 = vpop.permute.xlu1 %1578 }
 0x3c2   :  { %v1582_v19 = vmul.f32 %v1579_v18, %v1570_v16 }
 0x3c4   :  { %1602 = vmatpush.msrb.mxu0 %v1582_v19 }
 0x3c9   :  { %v1574_v21 = vpop.permute.xlu1 %1573 }
 0x3ca   :  { %v1581_v22 = vmul.f32 %v1574_v21, %v1569_v20 }
 0x3cc   :  { %1603 = vmatpush.msrb.mxu0 %v1581_v22 }
 0x3cd   :  { %2248 = vmatmul.msk.f32.vlgmr.msrb.gmra.mxu0 %vm1584_vm2, %v1583_v5 }
 0x44a   :  { %v1605_v23 = vpop.f32.mrf.mxu0 }
 0x44b   :  { %v1609_v24 = vsel %vm1608_vm3, %v1605_v23, -inf }
 0x44c   :  { %1610 = vmax.xlane.f32.xlu2 %v1609_v24 }
 0x4bf   :  { %v1611_v25 = vpop.xlane.xlu2 %1610 }
 0x4c0   :  { %v1612_v26 = vsub.f32 %v1605_v23, %v1611_v25 }
 0x4c2   :  { %v1613_v27 = vmul.f32 1.442695, %v1612_v26 }
 0x4c4   :  { %2420 = vpow2.f32 %v1613_v27 }
 0x4ca   :  { %v2421_v28 = vpop.eup %2420 }
 0x4cb   :  { %v1615_v29 = vsel %vm1608_vm3, %v2421_v28, 0.0 }
 0x4cc   :  { %1616 = vadd.xlane.f32.xlu2 %v1615_v29 }
 0x53f   :  { %v1617_v30 = vpop.xlane.xlu2 %1616 }
 0x540   :  { %2422 = vlog2.f32 %v1617_v30 }
 0x546   :  { %v2423_v31 = vpop.eup %2422 }
 0x547   :  { %v1619_v32 = vmul.f32 0.6931472, %v2423_v31 }
 0x549   :  { %v1620_v33 = vsub.f32 %v1612_v26, %v1619_v32 }
 0x54b   :  { %1621 = vst.msk [vmem:[#allocation12] sm:$0x3] %vm1608_vm3, %v1620_v33 }
 0x54c   :  { %1632 = dma.vmem_to_hbm [thread:$0]  %s1628_s12, 32, %s1630_s29, [#allocation5]  }
 0x54d   :  { %2574 = dma.done.wait [#allocation5], 32  }
 0x54e   :  { %2575 = vsyncadd [#allocation5], 4294967264 }
 0x54f   :  { %1637 = vsyncpa [#allocation4], 1 }
 0x550   :  { %1638 = vsyncpa [#allocation7], 1 }
 0x551   :  { %1639 = vsyncpa [#allocation10], 1 }
 0x552   :  { %1640 = vsyncpa [#allocation5], 1 }

</bundles_post_ra>
